<compile_context>
chip_gen: v5e
topology: v5e:2x2
jax: 0.10.0
libtpu: 0.0.40
codegen_flags: <defaults>
</compile_context>

<pallas_src>
import functools

import jax
import jax.numpy as jnp
from jax.experimental import pallas as pl
from jax.experimental.pallas import tpu as pltpu


# ---------------- Pallas kernel: fused (phase-matmul + BN + ReLU) ----------------

def _tconv_bn_relu_kernel(a_ref, w_ref, s_ref, t_ref, o_ref):
    # (TM, 4*C_in)bf16 @ (4*C_in, 4*C_out)bf16 -> f32 acc on the MXU,
    # then fused BatchNorm (per-column scale/shift) + ReLU epilogue in f32.
    acc = jnp.dot(a_ref[...], w_ref[...], preferred_element_type=jnp.float32)
    o_ref[...] = jnp.maximum(acc * s_ref[...] + t_ref[...], 0.0)


def _choose_row_tile(m, k, n):
    """Largest row tile whose double-buffered A+out blocks stay a few MiB and that
    still gives the grid >= 2 steps (so both v7x TensorCores get work)."""
    for tm in (1024, 512, 256, 128):
        blk_bytes = 2 * tm * k * 2 + 2 * tm * n * 4   # dbuf A (bf16) + dbuf out (f32)
        if blk_bytes <= (8 << 20) and m >= 2 * tm:
            return tm
    return 128


def _fused_phase_matmul(a, w_big, scale, shift):
    """a:(M, 4*C_in) bf16, w_big:(4*C_in, 4*C_out) bf16, scale/shift:(1, 4*C_out) f32."""
    m, k = a.shape
    nw = w_big.shape[1]
    tm = _choose_row_tile(m, k, nw)
    mp = ((m + tm - 1) // tm) * tm
    if mp != m:
        a = jnp.pad(a, ((0, mp - m), (0, 0)))          # folded into patch build, once

    # VMEM budget: double-buffered A, resident (conservatively x2) W, dbuf out, vecs.
    vmem_limit = 32 * 1024 * 1024
    vmem_need = 2 * (tm * k * 2 + k * nw * 2 + tm * nw * 4 + 2 * nw * 4)
    assert vmem_need <= vmem_limit, (vmem_need, vmem_limit)

    out = pl.pallas_call(
        _tconv_bn_relu_kernel,
        out_shape=jax.ShapeDtypeStruct((mp, nw), jnp.float32),
        grid=(mp // tm,),
        in_specs=[
            pl.BlockSpec((tm, k), lambda i: (i, 0)),    # activation patch rows
            pl.BlockSpec((k, nw), lambda i: (0, 0)),    # phase-concat weight (resident)
            pl.BlockSpec((1, nw), lambda i: (0, 0)),    # BN scale (per phase-column)
            pl.BlockSpec((1, nw), lambda i: (0, 0)),    # BN shift
        ],
        out_specs=pl.BlockSpec((tm, nw), lambda i: (i, 0)),
        compiler_params=pltpu.CompilerParams(
            dimension_semantics=("parallel",),
            vmem_limit_bytes=vmem_limit,
        ),
    )(a, w_big, scale, shift)
    return out[:m] if mp != m else out


# ---------------- one-time parameter preparation (outside jit) ----------------

def prepare_upsampler_params(wt, bn_gamma, bn_beta, bn_mean, bn_var, eps=1e-3):
    """wt: ConvTranspose2d weight, PyTorch layout (C_in, C_out, 3, 3).

    Builds the phase-concatenated binarized weight matrix (4*C_in, 4*C_out) in bf16
    plus folded BatchNorm scale/shift tiled across the 4 output phases."""
    c_in, c_out, kh, kw = wt.shape
    assert (kh, kw) == (3, 3)
    wb = jnp.where(wt > 0, 1.0, -1.0).astype(jnp.float32)   # sign(W); 0 -> -1

    def tap(a, b):
        return wb[:, :, a, b]                                # (C_in, C_out)
    zero = jnp.zeros((c_in, c_out), jnp.float32)

    # A's K axis is [x(i,j) | x(i,j+1) | x(i+1,j) | x(i+1,j+1)]; output columns are
    # the 4 phases [(0,0) | (0,1) | (1,0) | (1,1)] of (oh%2, ow%2) for stride=2,
    # padding=1, output_padding=1:
    #   p00 = x00*W[1,1]
    #   p01 = x00*W[1,2] + x01*W[1,0]
    #   p10 = x00*W[2,1] + x10*W[0,1]
    #   p11 = x00*W[2,2] + x01*W[2,0] + x10*W[0,2] + x11*W[0,0]
    row_x00 = jnp.concatenate([tap(1, 1), tap(1, 2), tap(2, 1), tap(2, 2)], axis=1)
    row_x01 = jnp.concatenate([zero,      tap(1, 0), zero,      tap(2, 0)], axis=1)
    row_x10 = jnp.concatenate([zero,      zero,      tap(0, 1), tap(0, 2)], axis=1)
    row_x11 = jnp.concatenate([zero,      zero,      zero,      tap(0, 0)], axis=1)
    w_big = jnp.concatenate([row_x00, row_x01, row_x10, row_x11], axis=0)

    scale = bn_gamma / jnp.sqrt(bn_var + eps)                # BN folded (running stats)
    shift = bn_beta - bn_mean * scale
    return {
        'w_big': w_big.astype(jnp.bfloat16),                 # +-1/0 exact in bf16
        'scale': jnp.tile(scale, 4)[None, :].astype(jnp.float32),
        'shift': jnp.tile(shift, 4)[None, :].astype(jnp.float32),
        'c_out': int(c_out),
    }


# ---------------- UpsamplerBlock forward (NCHW in / NCHW out) ----------------

def upsampler_block_forward(x_nchw, prep):
    x = jnp.transpose(x_nchw, (0, 2, 3, 1)).astype(jnp.float32)   # NCHW -> NHWC
    n, h, w, c_in = x.shape
    c_out = prep['c_out']

    # Binarization1.forward on activations (+1 if x>0 else -1); exact in bf16.
    # XLA fuses this with the phase-shift pads/concat (single patch materialization).
    xb = jnp.where(x > 0, 1.0, -1.0).astype(jnp.bfloat16)
    x01 = jnp.pad(xb[:, :, 1:, :], ((0, 0), (0, 0), (0, 1), (0, 0)))   # x[i, j+1]
    x10 = jnp.pad(xb[:, 1:, :, :], ((0, 0), (0, 1), (0, 0), (0, 0)))   # x[i+1, j]
    x11 = jnp.pad(xb[:, 1:, 1:, :], ((0, 0), (0, 1), (0, 1), (0, 0)))  # x[i+1, j+1]
    a = jnp.concatenate([xb, x01, x10, x11], axis=-1).reshape(n * h * w, 4 * c_in)

    y = _fused_phase_matmul(a, prep['w_big'], prep['scale'], prep['shift'])

    # Interleave the 4 phases spatially: (N,H,W,ph,pw,C) -> (N,2H,2W,C).
    y = y.reshape(n, h, w, 2, 2, c_out).transpose(0, 1, 3, 2, 4, 5)
    y = y.reshape(n, 2 * h, 2 * w, c_out)
    return jnp.transpose(y, (0, 3, 1, 2))                             # NHWC -> NCHW


# ---------------- pure-JAX reference (for the correctness check) ----------------

def _reference_forward(x_nchw, wt, bn_gamma, bn_beta, bn_mean, bn_var, eps=1e-3):
    x = jnp.transpose(x_nchw, (0, 2, 3, 1)).astype(jnp.float32)
    xb = jnp.where(x > 0, 1.0, -1.0)
    wb = jnp.where(wt > 0, 1.0, -1.0)                         # (C_in, C_out, 3, 3)
    w_hwio = jnp.transpose(wb[:, :, ::-1, ::-1], (2, 3, 0, 1))  # flip spatial, HWIO
    k, pad, op, s = 3, 1, 1, 2
    lo, hi = k - 1 - pad, k - 1 - pad + op
    y = jax.lax.conv_general_dilated(
        xb, w_hwio, window_strides=(1, 1),
        padding=((lo, hi), (lo, hi)), lhs_dilation=(s, s),
        dimension_numbers=('NHWC', 'HWIO', 'NHWC'),
        precision=jax.lax.Precision.HIGHEST)
    scale = bn_gamma / jnp.sqrt(bn_var + eps)
    shift = bn_beta - bn_mean * scale
    y = jnp.maximum(y * scale + shift, 0.0)
    return jnp.transpose(y, (0, 3, 1, 2))


# ---------------- demo / smoke test ----------------

if __name__ == "__main__":
    key = jax.random.PRNGKey(0)
    k_x, k_w, k_g, k_b, k_m, k_v = jax.random.split(key, 6)

    ninput, noutput = 128, 64           # ERFNet decoder: UpsamplerBlock(128, 64)
    batch, height, width = 2, 16, 16

    x = jax.random.normal(k_x, (batch, ninput, height, width), jnp.float32)
    wt = 0.1 * jax.random.normal(k_w, (ninput, noutput, 3, 3), jnp.float32)
    bn_gamma = 1.0 + 0.05 * jax.random.normal(k_g, (noutput,), jnp.float32)
    bn_beta = 0.05 * jax.random.normal(k_b, (noutput,), jnp.float32)
    bn_mean = 0.05 * jax.random.normal(k_m, (noutput,), jnp.float32)
    bn_var = 1.0 + jnp.abs(0.05 * jax.random.normal(k_v, (noutput,), jnp.float32))

    # One-time param prep (weight binarization + BN folding) outside the jit.
    prep = prepare_upsampler_params(wt, bn_gamma, bn_beta, bn_mean, bn_var)

    fwd = jax.jit(functools.partial(upsampler_block_forward, prep=prep))
    out = jax.block_until_ready(fwd(x))

    assert out.shape == (batch, noutput, 2 * height, 2 * width), out.shape
    assert bool(jnp.all(jnp.isfinite(out)))

    ref = _reference_forward(x, wt, bn_gamma, bn_beta, bn_mean, bn_var)
    max_err = float(jnp.max(jnp.abs(out - ref)))
    assert max_err < 1e-3, max_err

    print("KERNEL_OK")
</pallas_src>

<mosaic_0001>
module attributes {stable_mosaic.version = 11 : i64} {
  func.func @_tconv_bn_relu_kernel(%arg0: i32, %arg1: memref<256x512xbf16, #tpu.memory_space<vmem>>, %arg2: memref<512x256xbf16, #tpu.memory_space<vmem>>, %arg3: memref<1x256xf32, #tpu.memory_space<vmem>>, %arg4: memref<1x256xf32, #tpu.memory_space<vmem>>, %arg5: memref<256x256xf32, #tpu.memory_space<vmem>>) attributes {dimension_semantics = [#tpu.dimension_semantics<parallel>], iteration_bounds = array<i64: 2>, scalar_prefetch = 0 : i64, scratch_operands = 0 : i64, tpu.core_type = #tpu.core_type<tc>, window_params = [{transform_indices = @transform_0, window_bounds = array<i64: 256, 512>}, {pipeline_mode = #tpu.pipeline_mode<synchronous>, transform_indices = @transform_1, window_bounds = array<i64: 512, 256>}, {pipeline_mode = #tpu.pipeline_mode<synchronous>, transform_indices = @transform_2, window_bounds = array<i64: 1, 256>}, {pipeline_mode = #tpu.pipeline_mode<synchronous>, transform_indices = @transform_3, window_bounds = array<i64: 1, 256>}, {transform_indices = @transform_4, window_bounds = array<i64: 256, 256>}]} {
    %c0 = arith.constant 0 : index
    %c0_0 = arith.constant 0 : index
    %0 = vector.load %arg1[%c0, %c0_0] : memref<256x512xbf16, #tpu.memory_space<vmem>>, vector<256x512xbf16>
    %c0_1 = arith.constant 0 : index
    %c0_2 = arith.constant 0 : index
    %1 = vector.load %arg2[%c0_1, %c0_2] : memref<512x256xbf16, #tpu.memory_space<vmem>>, vector<512x256xbf16>
    %cst = arith.constant dense<0.000000e+00> : vector<256x256xf32>
    %2 = tpu.matmul %0, %1, %cst {dimension_numbers = #tpu.dot_dimension_numbers<[1], [0], [0], [1], [0, 0, 1, 1], [], []>} : vector<256x512xbf16>, vector<512x256xbf16>, vector<256x256xf32> -> vector<256x256xf32>
    %c0_3 = arith.constant 0 : index
    %c0_4 = arith.constant 0 : index
    %3 = vector.load %arg3[%c0_3, %c0_4] : memref<1x256xf32, #tpu.memory_space<vmem>>, vector<1x256xf32>
    %4 = vector.broadcast %3 : vector<1x256xf32> to vector<256x256xf32>
    %5 = arith.mulf %2, %4 : vector<256x256xf32>
    %c0_5 = arith.constant 0 : index
    %c0_6 = arith.constant 0 : index
    %6 = vector.load %arg4[%c0_5, %c0_6] : memref<1x256xf32, #tpu.memory_space<vmem>>, vector<1x256xf32>
    %7 = vector.broadcast %6 : vector<1x256xf32> to vector<256x256xf32>
    %8 = arith.addf %5, %7 : vector<256x256xf32>
    %cst_7 = arith.constant 0.000000e+00 : f32
    %9 = vector.broadcast %cst_7 : f32 to vector<256x256xf32>
    %10 = arith.maximumf %8, %9 : vector<256x256xf32>
    %c0_8 = arith.constant 0 : index
    %c0_9 = arith.constant 0 : index
    %11 = vector.load %arg5[%c0_8, %c0_9] : memref<256x256xf32, #tpu.memory_space<vmem>>, vector<256x256xf32>
    tpu.vector_store %arg5[%c0_8, %c0_9], %10 {strides = array<i32>} : memref<256x256xf32, #tpu.memory_space<vmem>>, vector<256x256xf32>,
    return
  }
  func.func @transform_0(%arg0: i32) -> (i32, i32) {
    %c0_i32 = arith.constant 0 : i32
    %c0_i32_0 = arith.constant 0 : i32
    return %arg0, %c0_i32 : i32, i32
  }
  func.func @transform_1(%arg0: i32) -> (i32, i32) {
    %c0_i32 = arith.constant 0 : i32
    %c0_i32_0 = arith.constant 0 : i32
    %c0_i32_1 = arith.constant 0 : i32
    return %c0_i32, %c0_i32_0 : i32, i32
  }
  func.func @transform_2(%arg0: i32) -> (i32, i32) {
    %c0_i32 = arith.constant 0 : i32
    %c0_i32_0 = arith.constant 0 : i32
    %c0_i32_1 = arith.constant 0 : i32
    return %c0_i32, %c0_i32_0 : i32, i32
  }
  func.func @transform_3(%arg0: i32) -> (i32, i32) {
    %c0_i32 = arith.constant 0 : i32
    %c0_i32_0 = arith.constant 0 : i32
    %c0_i32_1 = arith.constant 0 : i32
    return %c0_i32, %c0_i32_0 : i32, i32
  }
  func.func @transform_4(%arg0: i32) -> (i32, i32) {
    %c0_i32 = arith.constant 0 : i32
    %c0_i32_0 = arith.constant 0 : i32
    return %arg0, %c0_i32 : i32, i32
  }
}

</mosaic_0001>

<bundles_post_ra>
// kernel: upsampler_block_forward.1
= control target key start
LH: loop header
LB: loop body
LE: loop exit
PB: predicated region body
PF: predicated region fallthrough
CT: control target
= control target key end

     0   :  { %s2710_s15 = smov 0   ;;  %s3720_s0 = inlined_call_operand.vmem [shape: bf16[512,512], index: 0, kind: input, shape index: {}]   ;;  %s3721_s1 = inlined_call_operand.vmem [shape: bf16[512,256], index: 1, kind: input, shape index: {}]   ;;  %s3722_s2 = inlined_call_operand.vmem [shape: f32[1,256], index: 2, kind: input, shape index: {}]   ;;  %s3723_s3 = inlined_call_operand.vmem [shape: f32[1,256], index: 3, kind: input, shape index: {}]   ;;  %s3724_s4 = inlined_call_operand.vmem [shape: f32[512,256], index: 4, kind: output, shape index: {}]  }
   0x1 LB: > { %s2012_s16 = sadd.s32 4294967295, %s2683_s15   ;;  %p2016_p0 = scmp.ge.s32.totalorder %s2683_s15, 1  ;;  %s2683_s15 = sphi %s2710_s15, %s14_s15  }
   0x2   : > { %p164_p1 = scmp.lt.s32.totalorder %s2683_s15, 3 }
   0x4   : > { %p165_p2 = pnand %p2016_p0, %p164_p1 }
   0x6   : > { %168 = sbr.rel (%p165_p2) target bundleno = 694 (0x2b6), region = 36 }
   0xb   : > { %v2337_v0 = vld [vmem:[%s3721_s1 + $0x70] sm:$0xf]  ;;  %v2618_v1 = vld [vmem:[%s3721_s1 + $0x74] sm:$0xf0]  ;;  %v2329_v11 = vld [vmem:[%s3721_s1 + $0x60] sm:$0xf] }
   0xc   : > { %v2401_v2 = vld [vmem:[%s3721_s1 + $0xf0] sm:$0xf]  ;;  %v2338_v3 = vor.u32 %v2618_v1, %v2337_v0  ;;  %v2634_v4 = vld [vmem:[%s3721_s1 + $0xf4] sm:$0xf0]  ;;  %v2616_v13 = vld [vmem:[%s3721_s1 + $0x64] sm:$0xf0] }
   0xd   : > { %v2465_v5 = vld [vmem:[%s3721_s1 + $0x170] sm:$0xf]  ;;  %v2650_v6 = vld [vmem:[%s3721_s1 + $0x174] sm:$0xf0]  ;;  %v2402_v7 = vor.u32 %v2634_v4, %v2401_v2  ;;  %v2393_v14 = vld [vmem:[%s3721_s1 + $0xe0] sm:$0xf]  ;;  %v2330_v16 = vor.u32 %v2616_v13, %v2329_v11 }
   0xe   : > { %v2466_v8 = vor.u32 %v2650_v6, %v2465_v5  ;;  %v2529_v9 = vld [vmem:[%s3721_s1 + $0x1f0] sm:$0xf]  ;;  %v2666_v10 = vld [vmem:[%s3721_s1 + $0x1f4] sm:$0xf0]  ;;  %974 = vmatpush.bf16.msra.mxu0 %v2338_v3  ;;  %v2632_v15 = vld [vmem:[%s3721_s1 + $0xe4] sm:$0xf0] }
   0xf   : > { %v2530_v12 = vor.u32 %v2666_v10, %v2529_v9  ;;  %1063 = vmatpush.bf16.msra.mxu1 %v2402_v7  ;;  %v2394_v17 = vor.u32 %v2632_v15, %v2393_v14  ;;  %v2457_v18 = vld [vmem:[%s3721_s1 + $0x160] sm:$0xf]  ;;  %v2648_v19 = vld [vmem:[%s3721_s1 + $0x164] sm:$0xf0]  ;;  %v2321_v23 = vld [vmem:[%s3721_s1 + $0x50] sm:$0xf] }
  0x10   : > { %1152 = vmatpush.bf16.msra.mxu2 %v2466_v8  ;;  %v2521_v20 = vld [vmem:[%s3721_s1 + $0x1e0] sm:$0xf]  ;;  %v2458_v21 = vor.u32 %v2648_v19, %v2457_v18  ;;  %v2664_v22 = vld [vmem:[%s3721_s1 + $0x1e4] sm:$0xf0]  ;;  %v2614_v24 = vld [vmem:[%s3721_s1 + $0x54] sm:$0xf0] }
  0x11   : > { %1241 = vmatpush.bf16.msra.mxu3 %v2530_v12  ;;  %v2522_v25 = vor.u32 %v2664_v22, %v2521_v20  ;;  %v2385_v26 = vld [vmem:[%s3721_s1 + $0xd0] sm:$0xf]  ;;  %v2630_v27 = vld [vmem:[%s3721_s1 + $0xd4] sm:$0xf0]  ;;  %v2322_v29 = vor.u32 %v2614_v24, %v2321_v23  ;;  %v2313_v35 = vld [vmem:[%s3721_s1 + $0x40] sm:$0xf] }
  0x12   : > { %v2449_v28 = vld [vmem:[%s3721_s1 + $0x150] sm:$0xf]  ;;  %975 = vmatpush.bf16.msra.mxu0 %v2330_v16  ;;  %v2646_v30 = vld [vmem:[%s3721_s1 + $0x154] sm:$0xf0]  ;;  %v2386_v33 = vor.u32 %v2630_v27, %v2385_v26  ;;  %v2612_v36 = vld [vmem:[%s3721_s1 + $0x44] sm:$0xf0] }
  0x13   : > { %v2513_v31 = vld [vmem:[%s3721_s1 + $0x1d0] sm:$0xf]  ;;  %v2662_v32 = vld [vmem:[%s3721_s1 + $0x1d4] sm:$0xf0]  ;;  %1064 = vmatpush.bf16.msra.mxu1 %v2394_v17  ;;  %v2450_v34 = vor.u32 %v2646_v30, %v2449_v28  ;;  %v2377_v37 = vld [vmem:[%s3721_s1 + $0xc0] sm:$0xf]  ;;  %v2314_v44 = vor.u32 %v2612_v36, %v2313_v35 }
  0x14   : > { %1153 = vmatpush.bf16.msra.mxu2 %v2458_v21  ;;  %v2514_v38 = vor.u32 %v2662_v32, %v2513_v31  ;;  %v2628_v39 = vld [vmem:[%s3721_s1 + $0xc4] sm:$0xf0]  ;;  %v2441_v40 = vld [vmem:[%s3721_s1 + $0x140] sm:$0xf]  ;;  %v2305_v47 = vld [vmem:[%s3721_s1 + $0x30] sm:$0xf] }
  0x15   : > { %1242 = vmatpush.bf16.msra.mxu3 %v2522_v25  ;;  %v2644_v41 = vld [vmem:[%s3721_s1 + $0x144] sm:$0xf0]  ;;  %v2505_v42 = vld [vmem:[%s3721_s1 + $0x1c0] sm:$0xf]  ;;  %v2378_v45 = vor.u32 %v2628_v39, %v2377_v37  ;;  %v2610_v48 = vld [vmem:[%s3721_s1 + $0x34] sm:$0xf0] }
  0x16   : > { %v2660_v43 = vld [vmem:[%s3721_s1 + $0x1c4] sm:$0xf0]  ;;  %976 = vmatpush.bf16.msra.mxu0 %v2322_v29  ;;  %v2442_v46 = vor.u32 %v2644_v41, %v2441_v40  ;;  %v2369_v49 = vld [vmem:[%s3721_s1 + $0xb0] sm:$0xf]  ;;  %v2626_v51 = vld [vmem:[%s3721_s1 + $0xb4] sm:$0xf0]  ;;  %v2306_v56 = vor.u32 %v2610_v48, %v2305_v47 }
  0x17   : > { %1065 = vmatpush.bf16.msra.mxu1 %v2386_v33  ;;  %v2506_v50 = vor.u32 %v2660_v43, %v2505_v42  ;;  %v2433_v52 = vld [vmem:[%s3721_s1 + $0x130] sm:$0xf]  ;;  %v2642_v53 = vld [vmem:[%s3721_s1 + $0x134] sm:$0xf0]  ;;  %v2370_v57 = vor.u32 %v2626_v51, %v2369_v49  ;;  %v2297_v59 = vld [vmem:[%s3721_s1 + $0x20] sm:$0xf] }
  0x18   : > { %1154 = vmatpush.bf16.msra.mxu2 %v2450_v34  ;;  %v2497_v54 = vld [vmem:[%s3721_s1 + $0x1b0] sm:$0xf]  ;;  %v2658_v55 = vld [vmem:[%s3721_s1 + $0x1b4] sm:$0xf0]  ;;  %v2434_v58 = vor.u32 %v2642_v53, %v2433_v52  ;;  %v2608_v60 = vld [vmem:[%s3721_s1 + $0x24] sm:$0xf0] }
  0x19   : > { %1243 = vmatpush.bf16.msra.mxu3 %v2514_v38  ;;  %v2361_v61 = vld [vmem:[%s3721_s1 + $0xa0] sm:$0xf]  ;;  %v2498_v62 = vor.u32 %v2658_v55, %v2497_v54  ;;  %v2624_v63 = vld [vmem:[%s3721_s1 + $0xa4] sm:$0xf0]  ;;  %v2298_v4 = vor.u32 %v2608_v60, %v2297_v59  ;;  %v2289_v5 = vld [vmem:[%s3721_s1 + $0x10] sm:$0xf] }
  0x1a   : > { %977 = vmatpush.bf16.msra.mxu0 %v2314_v44  ;;  %v2425_v0 = vld [vmem:[%s3721_s1 + $0x120] sm:$0xf]  ;;  %v2640_v1 = vld [vmem:[%s3721_s1 + $0x124] sm:$0xf0]  ;;  %v2606_v6 = vld [vmem:[%s3721_s1 + $0x14] sm:$0xf0]  ;;  %v2362_v7 = vor.u32 %v2624_v63, %v2361_v61 }
  0x1b   : > { %1066 = vmatpush.bf16.msra.mxu1 %v2378_v45  ;;  %v2489_v2 = vld [vmem:[%s3721_s1 + $0x1a0] sm:$0xf]  ;;  %v2656_v3 = vld [vmem:[%s3721_s1 + $0x1a4] sm:$0xf0]  ;;  %v2426_v8 = vor.u32 %v2640_v1, %v2425_v0  ;;  %v2353_v9 = vld [vmem:[%s3721_s1 + $0x90] sm:$0xf]  ;;  %v2290_v17 = vor.u32 %v2606_v6, %v2289_v5 }
  0x1c   : > { %1155 = vmatpush.bf16.msra.mxu2 %v2442_v46  ;;  %v2622_v10 = vld [vmem:[%s3721_s1 + $0x94] sm:$0xf0]  ;;  %v2417_v11 = vld [vmem:[%s3721_s1 + $0x110] sm:$0xf]  ;;  %v2490_v12 = vor.u32 %v2656_v3, %v2489_v2  ;;  %s2017_s5 = sshll.u32 %s2012_s16, 5 }
  0x1d   : > { %1244 = vmatpush.bf16.msra.mxu3 %v2506_v50  ;;  %v2638_v13 = vld [vmem:[%s3721_s1 + $0x114] sm:$0xf0]  ;;  %v2481_v14 = vld [vmem:[%s3721_s1 + $0x190] sm:$0xf]  ;;  %v2281_v16 = vld [vmem:[%s3721_s1] sm:$0xf]  ;;  %v2354_v21 = vor.u32 %v2622_v10, %v2353_v9 }
  0x1e   : > { %978 = vmatpush.bf16.msra.mxu0 %v2306_v56  ;;  %v2654_v15 = vld [vmem:[%s3721_s1 + $0x194] sm:$0xf0]  ;;  %p193_p3 = scmp.lt.s32.totalorder %s2017_s5, 63  ;;  %v2604_v18 = vld [vmem:[%s3721_s1 + $0x4] sm:$0xf0]  ;;  %v2418_v22 = vor.u32 %v2638_v13, %v2417_v11 }
  0x1f   : > { %1067 = vmatpush.bf16.msra.mxu1 %v2370_v57  ;;  %v2345_v19 = vld [vmem:[%s3721_s1 + $0x80] sm:$0xf]  ;;  %v2620_v20 = vld [vmem:[%s3721_s1 + $0x84] sm:$0xf0]  ;;  %v2482_v25 = vor.u32 %v2654_v15, %v2481_v14  ;;  %v2649_v28 = vld [vmem:[%s3721_s1 + $0x174] sm:$0xf]  ;;  %v2282_v31 = vor.u32 %v2604_v18, %v2281_v16 }
  0x20   : > { %1156 = vmatpush.bf16.msra.mxu2 %v2434_v58  ;;  %v2409_v23 = vld [vmem:[%s3721_s1 + $0x100] sm:$0xf]  ;;  %v2636_v24 = vld [vmem:[%s3721_s1 + $0x104] sm:$0xf0]  ;;  %s3789_s5 = smov (!%p193_p3, %s2017_s5), 63  ;;  %v2346_v35 = vor.u32 %v2620_v20, %v2345_v19 }
  0x21   : > { %1245 = vmatpush.bf16.msra.mxu3 %v2498_v62  ;;  %v2473_v26 = vld [vmem:[%s3721_s1 + $0x180] sm:$0xf]  ;;  %v2652_v27 = vld [vmem:[%s3721_s1 + $0x184] sm:$0xf0]  ;;  %s2537_s27 = sshll.u32 %s3789_s5, 4  ;;  %v2410_v36 = vor.u32 %v2636_v24, %v2409_v23 }
  0x22   : > { %979 = vmatpush.bf16.msra.mxu0 %v2298_v4  ;;  %v2467_v29 = vld [vmem:[%s3721_s1 + $0x178] sm:$0xf0]  ;;  %v2665_v30 = vld [vmem:[%s3721_s1 + $0x1f4] sm:$0xf]  ;;  %s2929_s9 = scalar_lea.vmem %s3720_s0, %s2537_s27  ;;  %v2474_v41 = vor.u32 %v2652_v27, %v2473_v26  ;;  %v2647_v56 = vld [vmem:[%s3721_s1 + $0x164] sm:$0xf]  ;;  %s3259_s10 = scalar_lea.vmem %s3724_s4, %s2537_s27 }
  0x23   : > { %1068 = vmatpush.bf16.msra.mxu1 %v2362_v7  ;;  %v2531_v32 = vld [vmem:[%s3721_s1 + $0x1f8] sm:$0xf0]  ;;  %v2617_v33 = vld [vmem:[%s3721_s1 + $0x74] sm:$0xf]  ;;  %v2025_v37 = vld [vmem:[%s2929_s9] sm:$0xf]  ;;  %v2470_v45 = vor.u32 %v2649_v28, %v2467_v29 }
  0x24   : > { %1157 = vmatpush.bf16.msra.mxu2 %v2426_v8  ;;  %v2339_v34 = vld [vmem:[%s3721_s1 + $0x78] sm:$0xf0]  ;;  %v2541_v38 = vld [vmem:[%s2929_s9 + $0xc] sm:$0xf0]  ;;  %v2539_v39 = vld [vmem:[%s2929_s9 + $0x4] sm:$0xf]  ;;  %v2534_v49 = vor.u32 %v2665_v30, %v2531_v32 }
  0x25   : > { %1246 = vmatpush.bf16.msra.mxu3 %v2490_v12  ;;  %v2633_v40 = vld [vmem:[%s3721_s1 + $0xf4] sm:$0xf]  ;;  %v2033_v43 = vld [vmem:[%s2929_s9 + $0x8] sm:$0xf]  ;;  %v2542_v44 = vld [vmem:[%s2929_s9 + $0x14] sm:$0xf0]  ;;  %v2949_v46 = vor.u32 %v2541_v38, %v2025_v37  ;;  %v2342_v54 = vor.u32 %v2617_v33, %v2339_v34 }
  0x26   : > { %980 = vmatpush.bf16.msra.mxu0 %v2290_v17  ;;  %v2027_v42 = vld [vmem:[%s2929_s9 + $0x10] sm:$0xf0]  ;;  %v2540_v47 = vld [vmem:[%s2929_s9 + $0xc] sm:$0xf]  ;;  %v2035_v48 = vld [vmem:[%s2929_s9 + $0x18] sm:$0xf0]  ;;  %v2958_v52 = vor.u32 %v2542_v44, %v2033_v43 }
  0x27   : > { %1069 = vmatpush.bf16.msra.mxu1 %v2354_v21  ;;  %v2403_v50 = vld [vmem:[%s3721_s1 + $0xf8] sm:$0xf0]  ;;  %v2956_v51 = vor.u32 %v2539_v39, %v2027_v42  ;;  %v2960_v53 = vor.u32 %v2540_v47, %v2035_v48  ;;  %v2459_v57 = vld [vmem:[%s3721_s1 + $0x168] sm:$0xf0]  ;;  %v2663_v58 = vld [vmem:[%s3721_s1 + $0x1e4] sm:$0xf] }
  0x28   : > { %1158 = vmatpush.bf16.msra.mxu2 %v2418_v22  ;;  %v2406_v55 = vor.u32 %v2633_v40, %v2403_v50  ;;  %v2462_v59 = vor.u32 %v2647_v56, %v2459_v57  ;;  %v2523_v60 = vld [vmem:[%s3721_s1 + $0x1e8] sm:$0xf0]  ;;  %v2615_v61 = vld [vmem:[%s3721_s1 + $0x64] sm:$0xf]  ;;  %v2041_v4 = vld [vmem:[%s2929_s9 + $0x20] sm:$0xf] }
  0x29   : > { %1247 = vmatpush.bf16.msra.mxu3 %v2482_v25  ;;  %v2331_v62 = vld [vmem:[%s3721_s1 + $0x68] sm:$0xf0]  ;;  %v2526_v63 = vor.u32 %v2663_v58, %v2523_v60  ;;  %v2631_v1 = vld [vmem:[%s3721_s1 + $0xe4] sm:$0xf]  ;;  %v2545_v5 = vld [vmem:[%s2929_s9 + $0x2c] sm:$0xf0] }
  0x2a   : > { %981 = vmatpush.bf16.msra.mxu0 %v2282_v31  ;;  %v2334_v0 = vor.u32 %v2615_v61, %v2331_v62  ;;  %v2395_v2 = vld [vmem:[%s3721_s1 + $0xe8] sm:$0xf0]  ;;  %v2543_v6 = vld [vmem:[%s2929_s9 + $0x24] sm:$0xf]  ;;  %v2043_v7 = vld [vmem:[%s2929_s9 + $0x30] sm:$0xf0]  ;;  %v2998_v12 = vor.u32 %v2545_v5, %v2041_v4 }
  0x2b   : > { %1070 = vmatpush.bf16.msra.mxu1 %v2346_v35  ;;  %v2398_v3 = vor.u32 %v2631_v1, %v2395_v2  ;;  %v2049_v8 = vld [vmem:[%s2929_s9 + $0x28] sm:$0xf]  ;;  %v2546_v9 = vld [vmem:[%s2929_s9 + $0x34] sm:$0xf0]  ;;  %v2544_v10 = vld [vmem:[%s2929_s9 + $0x2c] sm:$0xf]  ;;  %v3000_v13 = vor.u32 %v2543_v6, %v2043_v7 }
  0x2c   : > { %1159 = vmatpush.bf16.msra.mxu2 %v2410_v36  ;;  %v2051_v11 = vld [vmem:[%s2929_s9 + $0x38] sm:$0xf0]  ;;  %v3002_v14 = vor.u32 %v2546_v9, %v2049_v8  ;;  %v2057_v16 = vld [vmem:[%s2929_s9 + $0x40] sm:$0xf]  ;;  %v2549_v17 = vld [vmem:[%s2929_s9 + $0x4c] sm:$0xf0] }
  0x2d   : > { %1248 = vmatpush.bf16.msra.mxu3 %v2474_v41  ;;  %982 = vmatmul.bf16.vlgmr.msra.gmra.mxu0 %v2949_v46  ;;  %v3004_v15 = vor.u32 %v2544_v10, %v2051_v11  ;;  %v2547_v18 = vld [vmem:[%s2929_s9 + $0x44] sm:$0xf]  ;;  %v2059_v19 = vld [vmem:[%s2929_s9 + $0x50] sm:$0xf0]  ;;  %v2065_v20 = vld [vmem:[%s2929_s9 + $0x48] sm:$0xf]  ;;  %v3018_v24 = vor.u32 %v2549_v17, %v2057_v16 }
  0x2e   : > { %1071 = vmatmul.bf16.vlgmr.msra.gmra.mxu1 %v2956_v51  ;;  %1330 = vmatpush.bf16.msrb.mxu0 %v2342_v54  ;;  %v2550_v21 = vld [vmem:[%s2929_s9 + $0x54] sm:$0xf0]  ;;  %v2548_v22 = vld [vmem:[%s2929_s9 + $0x4c] sm:$0xf]  ;;  %v2067_v23 = vld [vmem:[%s2929_s9 + $0x58] sm:$0xf0]  ;;  %v3020_v25 = vor.u32 %v2547_v18, %v2059_v19 }
  0x2f   : > { %1160 = vmatmul.bf16.vlgmr.msra.gmra.mxu2 %v2958_v52  ;;  %1419 = vmatpush.bf16.msrb.mxu1 %v2406_v55  ;;  %v3022_v26 = vor.u32 %v2550_v21, %v2065_v20  ;;  %v3024_v27 = vor.u32 %v2548_v22, %v2067_v23  ;;  %v2645_v28 = vld [vmem:[%s3721_s1 + $0x154] sm:$0xf]  ;;  %v2451_v29 = vld [vmem:[%s3721_s1 + $0x158] sm:$0xf0]  ;;  %v2073_v40 = vld [vmem:[%s2929_s9 + $0x60] sm:$0xf] }
  0x30   : > { %1508 = vmatpush.bf16.msrb.mxu2 %v2470_v45  ;;  %1249 = vmatmul.bf16.vlgmr.msra.gmra.mxu3 %v2960_v53  ;;  %v2661_v30 = vld [vmem:[%s3721_s1 + $0x1d4] sm:$0xf]  ;;  %v2454_v31 = vor.u32 %v2645_v28, %v2451_v29  ;;  %v2515_v32 = vld [vmem:[%s3721_s1 + $0x1d8] sm:$0xf0]  ;;  %v2553_v41 = vld [vmem:[%s2929_s9 + $0x6c] sm:$0xf0] }
  0x31   : > { %1597 = vmatpush.bf16.msrb.mxu3 %v2534_v49  ;;  %v2613_v33 = vld [vmem:[%s3721_s1 + $0x54] sm:$0xf]  ;;  %v2323_v34 = vld [vmem:[%s3721_s1 + $0x58] sm:$0xf0]  ;;  %v2518_v35 = vor.u32 %v2661_v30, %v2515_v32  ;;  %v2551_v42 = vld [vmem:[%s2929_s9 + $0x64] sm:$0xf]  ;;  %v3062_v49 = vor.u32 %v2553_v41, %v2073_v40 }
  0x32   : > { %1331 = vmatpush.bf16.msrb.mxu0 %v2334_v0  ;;  %v2326_v36 = vor.u32 %v2613_v33, %v2323_v34  ;;  %v2629_v37 = vld [vmem:[%s3721_s1 + $0xd4] sm:$0xf]  ;;  %v2387_v38 = vld [vmem:[%s3721_s1 + $0xd8] sm:$0xf0]  ;;  %v2081_v44 = vld [vmem:[%s2929_s9 + $0x68] sm:$0xf] }
  0x33   : > { %1420 = vmatpush.bf16.msrb.mxu1 %v2398_v3  ;;  %v2390_v39 = vor.u32 %v2629_v37, %v2387_v38  ;;  %v2075_v43 = vld [vmem:[%s2929_s9 + $0x70] sm:$0xf0]  ;;  %v2554_v45 = vld [vmem:[%s2929_s9 + $0x74] sm:$0xf0]  ;;  %v2552_v47 = vld [vmem:[%s2929_s9 + $0x6c] sm:$0xf] }
  0x34   : > { %1509 = vmatpush.bf16.msrb.mxu2 %v2462_v59  ;;  %v2083_v48 = vld [vmem:[%s2929_s9 + $0x78] sm:$0xf0]  ;;  %v3064_v50 = vor.u32 %v2551_v42, %v2075_v43  ;;  %v3066_v54 = vor.u32 %v2554_v45, %v2081_v44  ;;  %v2089_v56 = vld [vmem:[%s2929_s9 + $0x80] sm:$0xf]  ;;  %v2557_v57 = vld [vmem:[%s2929_s9 + $0x8c] sm:$0xf0] }
  0x35   : > { %1598 = vmatpush.bf16.msrb.mxu3 %v2526_v63  ;;  %v3068_v55 = vor.u32 %v2552_v47, %v2083_v48  ;;  %v2555_v58 = vld [vmem:[%s2929_s9 + $0x84] sm:$0xf]  ;;  %v2091_v59 = vld [vmem:[%s2929_s9 + $0x90] sm:$0xf0]  ;;  %v2097_v60 = vld [vmem:[%s2929_s9 + $0x88] sm:$0xf]  ;;  %v3082_v0 = vor.u32 %v2557_v57, %v2089_v56 }
  0x36   : > { %1332 = vmatpush.bf16.msrb.mxu0 %v2326_v36  ;;  %v2558_v61 = vld [vmem:[%s2929_s9 + $0x94] sm:$0xf0]  ;;  %v2556_v62 = vld [vmem:[%s2929_s9 + $0x8c] sm:$0xf]  ;;  %v2099_v63 = vld [vmem:[%s2929_s9 + $0x98] sm:$0xf0]  ;;  %v3084_v1 = vor.u32 %v2555_v58, %v2091_v59 }
  0x37   : > { %1421 = vmatpush.bf16.msrb.mxu1 %v2390_v39  ;;  %v3086_v2 = vor.u32 %v2558_v61, %v2097_v60  ;;  %v3088_v3 = vor.u32 %v2556_v62, %v2099_v63  ;;  %v2643_v4 = vld [vmem:[%s3721_s1 + $0x144] sm:$0xf]  ;;  %v2443_v5 = vld [vmem:[%s3721_s1 + $0x148] sm:$0xf0]  ;;  %v2105_v20 = vld [vmem:[%s2929_s9 + $0xa0] sm:$0xf] }
  0x38   : > { %1510 = vmatpush.bf16.msrb.mxu2 %v2454_v31  ;;  %v2659_v6 = vld [vmem:[%s3721_s1 + $0x1c4] sm:$0xf]  ;;  %v2446_v7 = vor.u32 %v2643_v4, %v2443_v5  ;;  %v2507_v8 = vld [vmem:[%s3721_s1 + $0x1c8] sm:$0xf0]  ;;  %v2561_v21 = vld [vmem:[%s2929_s9 + $0xac] sm:$0xf0] }
  0x39   : > { %1599 = vmatpush.bf16.msrb.mxu3 %v2518_v35  ;;  %v2611_v9 = vld [vmem:[%s3721_s1 + $0x44] sm:$0xf]  ;;  %v2315_v10 = vld [vmem:[%s3721_s1 + $0x48] sm:$0xf0]  ;;  %v2510_v11 = vor.u32 %v2659_v6, %v2507_v8  ;;  %v2107_v23 = vld [vmem:[%s2929_s9 + $0xb0] sm:$0xf0]  ;;  %v3126_v32 = vor.u32 %v2561_v21, %v2105_v20 }
  0x3a   : > { %v2318_v16 = vor.u32 %v2611_v9, %v2315_v10  ;;  %v2627_v17 = vld [vmem:[%s3721_s1 + $0xc4] sm:$0xf]  ;;  %v2379_v18 = vld [vmem:[%s3721_s1 + $0xc8] sm:$0xf0]  ;;  %v2113_v28 = vld [vmem:[%s2929_s9 + $0xa8] sm:$0xf] }
  0x3b   : > { %v2382_v19 = vor.u32 %v2627_v17, %v2379_v18  ;;  %v2559_v22 = vld [vmem:[%s2929_s9 + $0xa4] sm:$0xf]  ;;  %v2562_v29 = vld [vmem:[%s2929_s9 + $0xb4] sm:$0xf0]  ;;  %v2560_v30 = vld [vmem:[%s2929_s9 + $0xac] sm:$0xf] }
  0x3c   : > { %1511 = vmatpush.bf16.msrb.mxu2 %v2446_v7  ;;  %1333 = vmatpush.bf16.msrb.mxu0 %v2318_v16  ;;  %v2115_v31 = vld [vmem:[%s2929_s9 + $0xb8] sm:$0xf0]  ;;  %v3128_v33 = vor.u32 %v2559_v22, %v2107_v23  ;;  %v3130_v34 = vor.u32 %v2562_v29, %v2113_v28  ;;  %v2121_v36 = vld [vmem:[%s2929_s9 + $0xc0] sm:$0xf]  ;;  %v2565_v37 = vld [vmem:[%s2929_s9 + $0xcc] sm:$0xf0] }
  0x3d   : > { %987 = vmatmul.bf16.gmra.mxu0 %v2998_v12  ;;  %1600 = vmatpush.bf16.msrb.mxu3 %v2510_v11  ;;  %v3132_v35 = vor.u32 %v2560_v30, %v2115_v31  ;;  %v2563_v38 = vld [vmem:[%s2929_s9 + $0xc4] sm:$0xf]  ;;  %v2123_v39 = vld [vmem:[%s2929_s9 + $0xd0] sm:$0xf0]  ;;  %v2129_v40 = vld [vmem:[%s2929_s9 + $0xc8] sm:$0xf]  ;;  %v3146_v44 = vor.u32 %v2565_v37, %v2121_v36 }
  0x3e   : > { %1076 = vmatmul.bf16.gmra.mxu1 %v3000_v13  ;;  %v2566_v41 = vld [vmem:[%s2929_s9 + $0xd4] sm:$0xf0]  ;;  %v2564_v42 = vld [vmem:[%s2929_s9 + $0xcc] sm:$0xf]  ;;  %v2131_v43 = vld [vmem:[%s2929_s9 + $0xd8] sm:$0xf0]  ;;  %v3148_v45 = vor.u32 %v2563_v38, %v2123_v39 }
  0x3f   : > { %1165 = vmatmul.bf16.gmra.mxu2 %v3002_v14  ;;  %1422 = vmatpush.bf16.msrb.mxu1 %v2382_v19  ;;  %v3150_v47 = vor.u32 %v2566_v41, %v2129_v40  ;;  %v3152_v48 = vor.u32 %v2564_v42, %v2131_v43  ;;  %v2641_v56 = vld [vmem:[%s3721_s1 + $0x134] sm:$0xf]  ;;  %v2435_v57 = vld [vmem:[%s3721_s1 + $0x138] sm:$0xf0]  ;;  %v2137_v62 = vld [vmem:[%s2929_s9 + $0xe0] sm:$0xf] }
  0x40   : > { %1254 = vmatmul.bf16.gmra.mxu3 %v3004_v15  ;;  %v2657_v58 = vld [vmem:[%s3721_s1 + $0x1b4] sm:$0xf]  ;;  %v2438_v59 = vor.u32 %v2641_v56, %v2435_v57  ;;  %v2499_v60 = vld [vmem:[%s3721_s1 + $0x1b8] sm:$0xf0]  ;;  %v2569_v63 = vld [vmem:[%s2929_s9 + $0xec] sm:$0xf0] }
  0x41   : > { %v2502_v61 = vor.u32 %v2657_v58, %v2499_v60  ;;  %v2567_v4 = vld [vmem:[%s2929_s9 + $0xe4] sm:$0xf]  ;;  %v2139_v5 = vld [vmem:[%s2929_s9 + $0xf0] sm:$0xf0]  ;;  %v2145_v6 = vld [vmem:[%s2929_s9 + $0xe8] sm:$0xf]  ;;  %v3178_v10 = vor.u32 %v2569_v63, %v2137_v62 }
  0x42   : > { %1512 = vmatpush.bf16.msrb.mxu2 %v2438_v59  ;;  %v2570_v7 = vld [vmem:[%s2929_s9 + $0xf4] sm:$0xf0]  ;;  %v2568_v8 = vld [vmem:[%s2929_s9 + $0xec] sm:$0xf]  ;;  %v2147_v9 = vld [vmem:[%s2929_s9 + $0xf8] sm:$0xf0]  ;;  %v3180_v11 = vor.u32 %v2567_v4, %v2139_v5 }
  0x43   : > { %1601 = vmatpush.bf16.msrb.mxu3 %v2502_v61  ;;  %v3182_v16 = vor.u32 %v2570_v7, %v2145_v6  ;;  %v3184_v17 = vor.u32 %v2568_v8, %v2147_v9  ;;  %v2609_v18 = vld [vmem:[%s3721_s1 + $0x34] sm:$0xf]  ;;  %v2307_v19 = vld [vmem:[%s3721_s1 + $0x38] sm:$0xf0]  ;;  %v2153_v28 = vld [vmem:[%s2929_s9 + $0x100] sm:$0xf] }
  0x44   : > { %v2625_v20 = vld [vmem:[%s3721_s1 + $0xb4] sm:$0xf]  ;;  %v2310_v21 = vor.u32 %v2609_v18, %v2307_v19  ;;  %v2371_v22 = vld [vmem:[%s3721_s1 + $0xb8] sm:$0xf0]  ;;  %v2573_v29 = vld [vmem:[%s2929_s9 + $0x10c] sm:$0xf0] }
  0x45   : > { %v2374_v23 = vor.u32 %v2625_v20, %v2371_v22  ;;  %v2571_v30 = vld [vmem:[%s2929_s9 + $0x104] sm:$0xf]  ;;  %v2155_v31 = vld [vmem:[%s2929_s9 + $0x110] sm:$0xf0]  ;;  %v2161_v36 = vld [vmem:[%s2929_s9 + $0x108] sm:$0xf]  ;;  %v3210_v40 = vor.u32 %v2573_v29, %v2153_v28 }
  0x46   : > { %1334 = vmatpush.bf16.msrb.mxu0 %v2310_v21  ;;  %v2574_v37 = vld [vmem:[%s2929_s9 + $0x114] sm:$0xf0]  ;;  %v2572_v38 = vld [vmem:[%s2929_s9 + $0x10c] sm:$0xf]  ;;  %v2163_v39 = vld [vmem:[%s2929_s9 + $0x118] sm:$0xf0]  ;;  %v3212_v42 = vor.u32 %v2571_v30, %v2155_v31 }
  0x47   : > { %1423 = vmatpush.bf16.msrb.mxu1 %v2374_v23  ;;  %v3214_v43 = vor.u32 %v2574_v37, %v2161_v36  ;;  %v3216_v57 = vor.u32 %v2572_v38, %v2163_v39  ;;  %v1686_v59 = vld [vmem:[%s3722_s2] sm:$0x3]  ;;  %v2639_v9 = vld [vmem:[%s3721_s1 + $0x124] sm:$0xf]  ;;  %v2427_v18 = vld [vmem:[%s3721_s1 + $0x128] sm:$0xf0] }
  0x48   : > { %v1756_v60 = vld [vmem:[%s3723_s3] sm:$0x3]  ;;  %v3228_v4 = vperm.slane %v1686_v59, 0  ;;  %v2655_v19 = vld [vmem:[%s3721_s1 + $0x1a4] sm:$0xf]  ;;  %v2430_v20 = vor.u32 %v2639_v9, %v2427_v18 }
  0x49   : > { %v3230_v6 = vperm.slane %v1756_v60, 0  ;;  %v2491_v21 = vld [vmem:[%s3721_s1 + $0x1a8] sm:$0xf0]  ;;  %v2169_v23 = vld [vmem:[%s2929_s9 + $0x120] sm:$0xf] }
  0x4a   : > { %v2577_v28 = vld [vmem:[%s2929_s9 + $0x12c] sm:$0xf0]  ;;  %v2575_v29 = vld [vmem:[%s2929_s9 + $0x124] sm:$0xf]  ;;  %v2494_v30 = vor.u32 %v2655_v19, %v2491_v21  ;;  %v2171_v31 = vld [vmem:[%s2929_s9 + $0x130] sm:$0xf0]  ;;  %1513 = vmatpush.bf16.msrb.mxu2 %v2430_v20 }
  0x4b   : > { %v2177_v36 = vld [vmem:[%s2929_s9 + $0x128] sm:$0xf]  ;;  %v2578_v37 = vld [vmem:[%s2929_s9 + $0x134] sm:$0xf0]  ;;  %v3261_v59 = vor.u32 %v2577_v28, %v2169_v23  ;;  %v2607_v19 = vld [vmem:[%s3721_s1 + $0x24] sm:$0xf] }
  0x4c   : > { %1602 = vmatpush.bf16.msrb.mxu3 %v2494_v30  ;;  %v2299_v20 = vld [vmem:[%s3721_s1 + $0x28] sm:$0xf0]  ;;  %v2623_v21 = vld [vmem:[%s3721_s1 + $0xa4] sm:$0xf] }
  0x4d   : > { %992 = vmatmul.bf16.gmra.mxu0 %v3018_v24  ;;  %v2363_v23 = vld [vmem:[%s3721_s1 + $0xa8] sm:$0xf0] }
  0x4e   : > { %1081 = vmatmul.bf16.gmra.mxu1 %v3020_v25  ;;  %v2366_v30 = vor.u32 %v2623_v21, %v2363_v23  ;;  %v2195_v23 = vld [vmem:[%s2929_s9 + $0x158] sm:$0xf0] }
  0x4f   : > { %1170 = vmatmul.bf16.gmra.mxu2 %v3022_v26 }
  0x50   : > { %1259 = vmatmul.bf16.gmra.mxu3 %v3024_v27  ;;  %1424 = vmatpush.bf16.msrb.mxu1 %v2366_v30 }
  0x5d   : > { %997 = vmatmul.bf16.gmra.mxu0 %v3062_v49 }
  0x5e   : > { %1086 = vmatmul.bf16.gmra.mxu1 %v3064_v50 }
  0x5f   : > { %1175 = vmatmul.bf16.gmra.mxu2 %v3066_v54 }
  0x60   : > { %1264 = vmatmul.bf16.gmra.mxu3 %v3068_v55 }
  0x6d   : > { %1002 = vmatmul.bf16.gmra.mxu0 %v3082_v0 }
  0x6e   : > { %1091 = vmatmul.bf16.gmra.mxu1 %v3084_v1 }
  0x6f   : > { %1180 = vmatmul.bf16.gmra.mxu2 %v3086_v2 }
  0x70   : > { %1269 = vmatmul.bf16.gmra.mxu3 %v3088_v3 }
  0x7d   : > { %1007 = vmatmul.bf16.gmra.mxu0 %v3126_v32 }
  0x7e   : > { %1096 = vmatmul.bf16.gmra.mxu1 %v3128_v33 }
  0x7f   : > { %1185 = vmatmul.bf16.gmra.mxu2 %v3130_v34 }
  0x80   : > { %1274 = vmatmul.bf16.gmra.mxu3 %v3132_v35 }
  0x8d   : > { %1012 = vmatmul.bf16.gmra.mxu0 %v3146_v44 }
  0x8e   : > { %1101 = vmatmul.bf16.gmra.mxu1 %v3148_v45 }
  0x8f   : > { %1190 = vmatmul.bf16.gmra.mxu2 %v3150_v47 }
  0x90   : > { %1279 = vmatmul.bf16.gmra.mxu3 %v3152_v48 }
  0x9d   : > { %1017 = vmatmul.bf16.gmra.mxu0 %v3178_v10 }
  0x9e   : > { %1106 = vmatmul.bf16.gmra.mxu1 %v3180_v11 }
  0x9f   : > { %1195 = vmatmul.bf16.gmra.mxu2 %v3182_v16 }
  0xa0   : > { %1284 = vmatmul.bf16.gmra.mxu3 %v3184_v17 }
  0xaa   : > { %v983_v41 = vpop.f32.mrf.mxu0 }
  0xab   : > { %v1072_v56 = vpop.f32.mrf.mxu1 }
  0xac   : > { %v1073_v58 = vadd.f32 %v1072_v56, %v983_v41  ;;  %v2576_v41 = vld [vmem:[%s2929_s9 + $0x12c] sm:$0xf]  ;;  %v2179_v56 = vld [vmem:[%s2929_s9 + $0x138] sm:$0xf0] }
  0xad   : > { %1022 = vmatmul.bf16.gmra.mxu0 %v3210_v40  ;;  %v3267_v9 = vor.u32 %v2576_v41, %v2179_v56 }
  0xae   : > { %1111 = vmatmul.bf16.gmra.mxu1 %v3212_v42 }
  0xaf   : > { %1200 = vmatmul.bf16.gmra.mxu2 %v3214_v43  ;;  %3747 = vst [vmem:[#allocation3_spill] sm:$0xff] %v3267_v9 }
  0xb0   : > { %1289 = vmatmul.bf16.gmra.mxu3 %v3216_v57 }
  0xb2   : > { %v1161_v61 = vpop.f32.mrf.mxu2  ;;  %v985_v5 = vpop.f32.mrf.mxu0 }
  0xb3   : > { %v1162_v62 = vadd.f32 %v1161_v61, %v1073_v58  ;;  %v1250_v63 = vpop.f32.mrf.mxu3  ;;  %v1074_v7 = vpop.f32.mrf.mxu1 }
  0xb4   : > { %v1075_v39 = vadd.f32 %v1074_v7, %v985_v5  ;;  %v3265_v5 = vor.u32 %v2578_v37, %v2177_v36 }
  0xb5   : > { %v1251_v8 = vadd.f32 %v1250_v63, %v1162_v62 }
  0xb6   : > { %3746 = vst [vmem:[#allocation2_spill] sm:$0xff] %v3265_v5 }
  0xb7   : > { %v1692_v22 = vmul.f32 %v3228_v4, %v1251_v8  ;;  %v3263_v8 = vor.u32 %v2575_v29, %v2171_v31 }
  0xb9   : > { %v1762_v38 = vadd.f32 %v3230_v6, %v1692_v22  ;;  %v2302_v22 = vor.u32 %v2607_v19, %v2299_v20  ;;  %v2582_v19 = vld [vmem:[%s2929_s9 + $0x154] sm:$0xf0] }
  0xba   : > { %v1163_v58 = vpop.f32.mrf.mxu2  ;;  %v988_v63 = vpop.f32.mrf.mxu0 }
  0xbb   : > { %v1826_v60 = vmax.f32 %v1762_v38, 0.0  ;;  %v1164_v61 = vadd.f32 %v1163_v58, %v1075_v39  ;;  %v1252_v62 = vpop.f32.mrf.mxu3  ;;  %v1077_v7 = vpop.f32.mrf.mxu1  ;;  %1335 = vmatpush.bf16.msrb.mxu0 %v2302_v22  ;;  %v2580_v22 = vld [vmem:[%s2929_s9 + $0x14c] sm:$0xf] }
  0xbc   : > { %v1078_v29 = vadd.f32 %v1077_v7, %v988_v63  ;;  %v2579_v63 = vld [vmem:[%s2929_s9 + $0x144] sm:$0xf]  ;;  %v2187_v7 = vld [vmem:[%s2929_s9 + $0x150] sm:$0xf0] }
  0xbd   : > { %1890 = vst [vmem:[%s3259_s10] sm:$0xff] %v1826_v60  ;;  %v1253_v18 = vadd.f32 %v1252_v62, %v1164_v61  ;;  %1027 = vmatmul.bf16.gmra.mxu0 %v3261_v59  ;;  %v2185_v61 = vld [vmem:[%s2929_s9 + $0x140] sm:$0xf]  ;;  %v2581_v62 = vld [vmem:[%s2929_s9 + $0x14c] sm:$0xf0] }
  0xbe   : > { %1116 = vmatmul.bf16.gmra.mxu1 %v3263_v8 }
  0xbf   : > { %v1694_v28 = vmul.f32 %v3228_v4, %v1253_v18  ;;  %1205 = vmatmul.bf16.gmra.mxu2 %v3265_v5  ;;  %v2193_v18 = vld [vmem:[%s2929_s9 + $0x148] sm:$0xf] }
  0xc0   : > { %1294 = vmatmul.bf16.gmra.mxu3 %v3267_v9  ;;  %v3305_v9 = vor.u32 %v2580_v22, %v2195_v23  ;;  %v2637_v22 = vld [vmem:[%s3721_s1 + $0x114] sm:$0xf]  ;;  %v2419_v23 = vld [vmem:[%s3721_s1 + $0x118] sm:$0xf0] }
  0xc1   : > { %v1764_v31 = vadd.f32 %v3230_v6, %v1694_v28 }
  0xc2   : > { %v1166_v36 = vpop.f32.mrf.mxu2  ;;  %v990_v41 = vpop.f32.mrf.mxu0  ;;  %3751 = vst [vmem:[#allocation7_spill] sm:$0xff] %v3305_v9 }
  0xc3   : > { %v1828_v37 = vmax.f32 %v1764_v31, 0.0  ;;  %v1167_v38 = vadd.f32 %v1166_v36, %v1078_v29  ;;  %v1255_v39 = vpop.f32.mrf.mxu3  ;;  %v1079_v56 = vpop.f32.mrf.mxu1  ;;  %v3299_v29 = vor.u32 %v2581_v62, %v2185_v61 }
  0xc4   : > { %v1080_v21 = vadd.f32 %v1079_v56, %v990_v41 }
  0xc5   : > { %1892 = vst [vmem:[%s3259_s10 + $0x10] sm:$0xff] %v1828_v37  ;;  %v1256_v58 = vadd.f32 %v1255_v39, %v1167_v38  ;;  %v3301_v38 = vor.u32 %v2579_v63, %v2187_v7  ;;  %v3303_v39 = vor.u32 %v2582_v19, %v2193_v18 }
  0xc6   : > { %3748 = vst [vmem:[#allocation4_spill] sm:$0xff] %v3299_v29 }
  0xc7   : > { %v1696_v60 = vmul.f32 %v3228_v4, %v1256_v58  ;;  %3749 = vst [vmem:[#allocation5_spill] sm:$0xff] %v3301_v38 }
  0xc8   : > { %3750 = vst [vmem:[#allocation6_spill] sm:$0xff] %v3303_v39 }
  0xc9   : > { %v1766_v20 = vadd.f32 %v3230_v6, %v1696_v60 }
  0xca   : > { %v1168_v28 = vpop.f32.mrf.mxu2  ;;  %v993_v37 = vpop.f32.mrf.mxu0 }
  0xcb   : > { %v1830_v30 = vmax.f32 %v1766_v20, 0.0  ;;  %v1169_v31 = vadd.f32 %v1168_v28, %v1080_v21  ;;  %v1257_v36 = vpop.f32.mrf.mxu3  ;;  %v1082_v58 = vpop.f32.mrf.mxu1  ;;  %v2422_v28 = vor.u32 %v2637_v22, %v2419_v23  ;;  %v2211_v22 = vld [vmem:[%s2929_s9 + $0x178] sm:$0xf0] }
  0xcc   : > { %v1083_v56 = vadd.f32 %v1082_v58, %v993_v37  ;;  %v2201_v37 = vld [vmem:[%s2929_s9 + $0x160] sm:$0xf]  ;;  %v2585_v58 = vld [vmem:[%s2929_s9 + $0x16c] sm:$0xf0] }
  0xcd   : > { %1894 = vst [vmem:[%s3259_s10 + $0x20] sm:$0xff] %v1830_v30  ;;  %v1258_v60 = vadd.f32 %v1257_v36, %v1169_v31  ;;  %1032 = vmatmul.bf16.gmra.mxu0 %v3299_v29  ;;  %v2653_v30 = vld [vmem:[%s3721_s1 + $0x194] sm:$0xf]  ;;  %v2483_v31 = vld [vmem:[%s3721_s1 + $0x198] sm:$0xf0]  ;;  %1514 = vmatpush.bf16.msrb.mxu2 %v2422_v28 }
  0xce   : > { %1121 = vmatmul.bf16.gmra.mxu1 %v3301_v38 }
  0xcf   : > { %v1698_v41 = vmul.f32 %v3228_v4, %v1258_v60  ;;  %1210 = vmatmul.bf16.gmra.mxu2 %v3303_v39  ;;  %v2583_v60 = vld [vmem:[%s2929_s9 + $0x164] sm:$0xf] }
  0xd0   : > { %1299 = vmatmul.bf16.gmra.mxu3 %v3305_v9  ;;  %v3337_v9 = vor.u32 %v2585_v58, %v2201_v37  ;;  %v2621_v58 = vld [vmem:[%s3721_s1 + $0x94] sm:$0xf] }
  0xd1   : > { %v1768_v61 = vadd.f32 %v3230_v6, %v1698_v41  ;;  %v2486_v41 = vor.u32 %v2653_v30, %v2483_v31 }
  0xd2   : > { %v1171_v62 = vpop.f32.mrf.mxu2  ;;  %v995_v19 = vpop.f32.mrf.mxu0  ;;  %3752 = vst [vmem:[#allocation8_spill] sm:$0xff] %v3337_v9 }
  0xd3   : > { %v1832_v63 = vmax.f32 %v1768_v61, 0.0  ;;  %v1172_v7 = vadd.f32 %v1171_v62, %v1083_v56  ;;  %v1260_v18 = vpop.f32.mrf.mxu3  ;;  %v1084_v20 = vpop.f32.mrf.mxu1  ;;  %v2203_v56 = vld [vmem:[%s2929_s9 + $0x170] sm:$0xf0]  ;;  %v2209_v61 = vld [vmem:[%s2929_s9 + $0x168] sm:$0xf]  ;;  %1603 = vmatpush.bf16.msrb.mxu3 %v2486_v41 }
  0xd4   : > { %v2586_v62 = vld [vmem:[%s2929_s9 + $0x174] sm:$0xf0]  ;;  %v3339_v5 = vor.u32 %v2583_v60, %v2203_v56 }
  0xd5   : > { %1896 = vst [vmem:[%s3259_s10 + $0x30] sm:$0xff] %v1832_v63  ;;  %v1261_v21 = vadd.f32 %v1260_v18, %v1172_v7  ;;  %v1085_v7 = vadd.f32 %v1084_v20, %v995_v19  ;;  %v2584_v18 = vld [vmem:[%s2929_s9 + $0x16c] sm:$0xf]  ;;  %v3341_v30 = vor.u32 %v2586_v62, %v2209_v61  ;;  %v2605_v19 = vld [vmem:[%s3721_s1 + $0x14] sm:$0xf] }
  0xd6   : > { %3753 = vst [vmem:[#allocation9_spill] sm:$0xff] %v3339_v5  ;;  %v3343_v28 = vor.u32 %v2584_v18, %v2211_v22  ;;  %v2291_v20 = vld [vmem:[%s3721_s1 + $0x18] sm:$0xf0] }
  0xd7   : > { %v1700_v36 = vmul.f32 %v3228_v4, %v1261_v21  ;;  %3754 = vst [vmem:[#allocation10_spill] sm:$0xff] %v3341_v30  ;;  %v2294_v37 = vor.u32 %v2605_v19, %v2291_v20  ;;  %v2219_v19 = vld [vmem:[%s2929_s9 + $0x190] sm:$0xf0]  ;;  %v2225_v20 = vld [vmem:[%s2929_s9 + $0x188] sm:$0xf] }
  0xd8   : > { %3755 = vst [vmem:[#allocation11_spill] sm:$0xff] %v3343_v28 }
  0xd9   : > { %v1770_v63 = vadd.f32 %v3230_v6, %v1700_v36  ;;  %1336 = vmatpush.bf16.msrb.mxu0 %v2294_v37  ;;  %v2590_v37 = vld [vmem:[%s2929_s9 + $0x194] sm:$0xf0] }
  0xda   : > { %v1173_v23 = vpop.f32.mrf.mxu2  ;;  %v998_v29 = vpop.f32.mrf.mxu0 }
  0xdb   : > { %v1834_v39 = vmax.f32 %v1770_v63, 0.0  ;;  %v1174_v21 = vadd.f32 %v1173_v23, %v1085_v7  ;;  %v1262_v38 = vpop.f32.mrf.mxu3  ;;  %v1087_v31 = vpop.f32.mrf.mxu1 }
  0xdc   : > { %v1088_v60 = vadd.f32 %v1087_v31, %v998_v29  ;;  %v2589_v31 = vld [vmem:[%s2929_s9 + $0x18c] sm:$0xf0] }
  0xdd   : > { %1898 = vst [vmem:[%s3259_s10 + $0x40] sm:$0xff] %v1834_v39  ;;  %v1263_v36 = vadd.f32 %v1262_v38, %v1174_v21  ;;  %1037 = vmatmul.bf16.gmra.mxu0 %v3337_v9  ;;  %v2355_v39 = vld [vmem:[%s3721_s1 + $0x98] sm:$0xf0]  ;;  %v2217_v21 = vld [vmem:[%s2929_s9 + $0x180] sm:$0xf] }
  0xde   : > { %1126 = vmatmul.bf16.gmra.mxu1 %v3339_v5  ;;  %v2358_v41 = vor.u32 %v2621_v58, %v2355_v39 }
  0xdf   : > { %v1702_v38 = vmul.f32 %v3228_v4, %v1263_v36  ;;  %1215 = vmatmul.bf16.gmra.mxu2 %v3341_v30  ;;  %v2587_v36 = vld [vmem:[%s2929_s9 + $0x184] sm:$0xf] }
  0xe0   : > { %1304 = vmatmul.bf16.gmra.mxu3 %v3343_v28  ;;  %1425 = vmatpush.bf16.msrb.mxu1 %v2358_v41  ;;  %v3379_v28 = vor.u32 %v2590_v37, %v2225_v20 }
  0xe1   : > { %v1772_v56 = vadd.f32 %v3230_v6, %v1702_v38  ;;  %v2588_v38 = vld [vmem:[%s2929_s9 + $0x18c] sm:$0xf] }
  0xe2   : > { %v1176_v61 = vpop.f32.mrf.mxu2  ;;  %v1000_v7 = vpop.f32.mrf.mxu0  ;;  %3758 = vst [vmem:[#allocation14_spill] sm:$0xff] %v3379_v28 }
  0xe3   : > { %v1836_v62 = vmax.f32 %v1772_v56, 0.0  ;;  %v1177_v29 = vadd.f32 %v1176_v61, %v1088_v60  ;;  %v1265_v63 = vpop.f32.mrf.mxu3  ;;  %v1089_v18 = vpop.f32.mrf.mxu1  ;;  %v2227_v60 = vld [vmem:[%s2929_s9 + $0x198] sm:$0xf0]  ;;  %v3375_v56 = vor.u32 %v2589_v31, %v2217_v21 }
  0xe4   : > { %v1090_v39 = vadd.f32 %v1089_v18, %v1000_v7  ;;  %v3381_v5 = vor.u32 %v2588_v38, %v2227_v60  ;;  %v2411_v38 = vld [vmem:[%s3721_s1 + $0x108] sm:$0xf0] }
  0xe5   : > { %1900 = vst [vmem:[%s3259_s10 + $0x50] sm:$0xff] %v1836_v62  ;;  %v1266_v22 = vadd.f32 %v1265_v63, %v1177_v29 }
  0xe6   : > { %3756 = vst [vmem:[#allocation12_spill] sm:$0xff] %v3375_v56 }
  0xe7   : > { %v1704_v23 = vmul.f32 %v3228_v4, %v1266_v22  ;;  %v3377_v22 = vor.u32 %v2587_v36, %v2219_v19  ;;  %3759 = vst [vmem:[#allocation15_spill] sm:$0xff] %v3381_v5 }
  0xe9   : > { %v1774_v58 = vadd.f32 %v3230_v6, %v1704_v23  ;;  %3757 = vst [vmem:[#allocation13_spill] sm:$0xff] %v3377_v22 }
  0xea   : > { %v1178_v41 = vpop.f32.mrf.mxu2  ;;  %v1003_v63 = vpop.f32.mrf.mxu0 }
  0xeb   : > { %v1838_v61 = vmax.f32 %v1774_v58, 0.0  ;;  %v1179_v62 = vadd.f32 %v1178_v41, %v1090_v39  ;;  %v1267_v29 = vpop.f32.mrf.mxu3  ;;  %v1092_v30 = vpop.f32.mrf.mxu1  ;;  %v2635_v39 = vld [vmem:[%s3721_s1 + $0x104] sm:$0xf] }
  0xec   : > { %v1093_v18 = vadd.f32 %v1092_v30, %v1003_v63  ;;  %v2414_v60 = vor.u32 %v2635_v39, %v2411_v38  ;;  %v2651_v41 = vld [vmem:[%s3721_s1 + $0x184] sm:$0xf]  ;;  %v2593_v63 = vld [vmem:[%s2929_s9 + $0x1ac] sm:$0xf0]  ;;  %v2243_v39 = vld [vmem:[%s2929_s9 + $0x1b8] sm:$0xf0] }
  0xed   : > { %1902 = vst [vmem:[%s3259_s10 + $0x60] sm:$0xff] %v1838_v61  ;;  %v1268_v23 = vadd.f32 %v1267_v29, %v1179_v62  ;;  %1042 = vmatmul.bf16.gmra.mxu0 %v3375_v56  ;;  %v2475_v61 = vld [vmem:[%s3721_s1 + $0x188] sm:$0xf0]  ;;  %v2233_v29 = vld [vmem:[%s2929_s9 + $0x1a0] sm:$0xf] }
  0xee   : > { %1131 = vmatmul.bf16.gmra.mxu1 %v3377_v22  ;;  %1515 = vmatpush.bf16.msrb.mxu2 %v2414_v60 }
  0xef   : > { %v1706_v7 = vmul.f32 %v3228_v4, %v1268_v23  ;;  %1220 = vmatmul.bf16.gmra.mxu2 %v3379_v28  ;;  %v2591_v23 = vld [vmem:[%s2929_s9 + $0x1a4] sm:$0xf] }
  0xf0   : > { %1309 = vmatmul.bf16.gmra.mxu3 %v3381_v5  ;;  %v3413_v5 = vor.u32 %v2593_v63, %v2233_v29  ;;  %v2619_v63 = vld [vmem:[%s3721_s1 + $0x84] sm:$0xf] }
  0xf1   : > { %v1776_v21 = vadd.f32 %v3230_v6, %v1706_v7  ;;  %v2478_v7 = vor.u32 %v2651_v41, %v2475_v61 }
  0xf2   : > { %v1181_v31 = vpop.f32.mrf.mxu2  ;;  %v1005_v37 = vpop.f32.mrf.mxu0 }
  0xf3   : > { %v1840_v36 = vmax.f32 %v1776_v21, 0.0  ;;  %v1182_v19 = vadd.f32 %v1181_v31, %v1093_v18  ;;  %v1270_v20 = vpop.f32.mrf.mxu3  ;;  %v1094_v30 = vpop.f32.mrf.mxu1  ;;  %v2235_v18 = vld [vmem:[%s2929_s9 + $0x1b0] sm:$0xf0]  ;;  %v2241_v21 = vld [vmem:[%s2929_s9 + $0x1a8] sm:$0xf]  ;;  %1604 = vmatpush.bf16.msrb.mxu3 %v2478_v7 }
  0xf4   : > { %v2594_v31 = vld [vmem:[%s2929_s9 + $0x1b4] sm:$0xf0]  ;;  %v3415_v9 = vor.u32 %v2591_v23, %v2235_v18 }
  0xf5   : > { %1904 = vst [vmem:[%s3259_s10 + $0x70] sm:$0xff] %v1840_v36  ;;  %v1271_v58 = vadd.f32 %v1270_v20, %v1182_v19  ;;  %v1095_v19 = vadd.f32 %v1094_v30, %v1005_v37  ;;  %v2592_v20 = vld [vmem:[%s2929_s9 + $0x1ac] sm:$0xf]  ;;  %v3417_v41 = vor.u32 %v2594_v31, %v2241_v21  ;;  %v2603_v37 = vld [vmem:[%s3721_s1 + $0x4] sm:$0xf] }
  0xf6   : > { %3760 = vst [vmem:[#allocation16_spill] sm:$0xff] %v3415_v9  ;;  %v3419_v60 = vor.u32 %v2592_v20, %v2243_v39  ;;  %v2283_v30 = vld [vmem:[%s3721_s1 + $0x8] sm:$0xf0] }
  0xf7   : > { %v1708_v62 = vmul.f32 %v3228_v4, %v1271_v58  ;;  %3761 = vst [vmem:[#allocation17_spill] sm:$0xff] %v3417_v41  ;;  %v2286_v29 = vor.u32 %v2603_v37, %v2283_v30  ;;  %v2251_v37 = vld [vmem:[%s2929_s9 + $0x1d0] sm:$0xf0]  ;;  %v2257_v30 = vld [vmem:[%s2929_s9 + $0x1c8] sm:$0xf] }
  0xf8   : > { %3762 = vst [vmem:[#allocation18_spill] sm:$0xff] %v3419_v60 }
  0xf9   : > { %v1778_v36 = vadd.f32 %v3230_v6, %v1708_v62  ;;  %1337 = vmatpush.bf16.msrb.mxu0 %v2286_v29  ;;  %v2598_v29 = vld [vmem:[%s2929_s9 + $0x1d4] sm:$0xf0] }
  0xfa   : > { %v1183_v38 = vpop.f32.mrf.mxu2  ;;  %v1008_v56 = vpop.f32.mrf.mxu0 }
  0xfb   : > { %v1842_v28 = vmax.f32 %v1778_v36, 0.0  ;;  %v1184_v58 = vadd.f32 %v1183_v38, %v1095_v19  ;;  %v1272_v22 = vpop.f32.mrf.mxu3  ;;  %v1097_v61 = vpop.f32.mrf.mxu1 }
  0xfc   : > { %v1098_v23 = vadd.f32 %v1097_v61, %v1008_v56  ;;  %v2597_v61 = vld [vmem:[%s2929_s9 + $0x1cc] sm:$0xf0] }
  0xfd   : > { %1906 = vst [vmem:[%s3259_s10 + $0x80] sm:$0xff] %v1842_v28  ;;  %v1273_v62 = vadd.f32 %v1272_v22, %v1184_v58  ;;  %1047 = vmatmul.bf16.gmra.mxu0 %v3413_v5  ;;  %v2347_v28 = vld [vmem:[%s3721_s1 + $0x88] sm:$0xf0]  ;;  %v2249_v58 = vld [vmem:[%s2929_s9 + $0x1c0] sm:$0xf] }
  0xfe   : > { %1136 = vmatmul.bf16.gmra.mxu1 %v3415_v9  ;;  %v2350_v7 = vor.u32 %v2619_v63, %v2347_v28 }
  0xff   : > { %v1710_v22 = vmul.f32 %v3228_v4, %v1273_v62  ;;  %1225 = vmatmul.bf16.gmra.mxu2 %v3417_v41  ;;  %v2595_v62 = vld [vmem:[%s2929_s9 + $0x1c4] sm:$0xf] }
 0x100   : > { %1314 = vmatmul.bf16.gmra.mxu3 %v3419_v60  ;;  %1426 = vmatpush.bf16.msrb.mxu1 %v2350_v7  ;;  %v3455_v60 = vor.u32 %v2598_v29, %v2257_v30 }
 0x101   : > { %v1780_v18 = vadd.f32 %v3230_v6, %v1710_v22  ;;  %v2596_v22 = vld [vmem:[%s2929_s9 + $0x1cc] sm:$0xf] }
 0x102   : > { %v1186_v21 = vpop.f32.mrf.mxu2  ;;  %v1010_v19 = vpop.f32.mrf.mxu0  ;;  %3765 = vst [vmem:[#allocation21_spill] sm:$0xff] %v3455_v60 }
 0x103   : > { %v1844_v31 = vmax.f32 %v1780_v18, 0.0  ;;  %v1187_v56 = vadd.f32 %v1186_v21, %v1098_v23  ;;  %v1275_v36 = vpop.f32.mrf.mxu3  ;;  %v1099_v20 = vpop.f32.mrf.mxu1  ;;  %v2259_v23 = vld [vmem:[%s2929_s9 + $0x1d8] sm:$0xf0]  ;;  %v3451_v18 = vor.u32 %v2597_v61, %v2249_v58 }
 0x104   : > { %v1100_v28 = vadd.f32 %v1099_v20, %v1010_v19  ;;  %v3457_v9 = vor.u32 %v2596_v22, %v2259_v23  ;;  %v2265_v22 = vld [vmem:[%s2929_s9 + $0x1e0] sm:$0xf]  ;;  %v2601_v23 = vld [vmem:[%s2929_s9 + $0x1ec] sm:$0xf0] }
 0x105   : > { %1908 = vst [vmem:[%s3259_s10 + $0x90] sm:$0xff] %v1844_v31  ;;  %v1276_v39 = vadd.f32 %v1275_v36, %v1187_v56 }
 0x106   : > { %3763 = vst [vmem:[#allocation19_spill] sm:$0xff] %v3451_v18 }
 0x107   : > { %v1712_v38 = vmul.f32 %v3228_v4, %v1276_v39  ;;  %v3453_v39 = vor.u32 %v2595_v62, %v2251_v37  ;;  %3766 = vst [vmem:[#allocation22_spill] sm:$0xff] %v3457_v9 }
 0x109   : > { %v1782_v63 = vadd.f32 %v3230_v6, %v1712_v38  ;;  %3764 = vst [vmem:[#allocation20_spill] sm:$0xff] %v3453_v39 }
 0x10a   : > { %v1188_v7 = vpop.f32.mrf.mxu2  ;;  %v1013_v36 = vpop.f32.mrf.mxu0 }
 0x10b   : > { %v1846_v21 = vmax.f32 %v1782_v63, 0.0  ;;  %v1189_v31 = vadd.f32 %v1188_v7, %v1100_v28  ;;  %v1277_v56 = vpop.f32.mrf.mxu3  ;;  %v1102_v41 = vpop.f32.mrf.mxu1  ;;  %v2599_v7 = vld [vmem:[%s2929_s9 + $0x1e4] sm:$0xf] }
 0x10c   : > { %v1103_v20 = vadd.f32 %v1102_v41, %v1013_v36 }
 0x10d   : > { %1910 = vst [vmem:[%s3259_s10 + $0xa0] sm:$0xff] %v1846_v21  ;;  %v1278_v38 = vadd.f32 %v1277_v56, %v1189_v31  ;;  %1052 = vmatmul.bf16.gmra.mxu0 %v3451_v18  ;;  %v2267_v21 = vld [vmem:[%s2929_s9 + $0x1f0] sm:$0xf0]  ;;  %v2273_v31 = vld [vmem:[%s2929_s9 + $0x1e8] sm:$0xf] }
 0x10e   : > { %1141 = vmatmul.bf16.gmra.mxu1 %v3453_v39  ;;  %v2602_v56 = vld [vmem:[%s2929_s9 + $0x1f4] sm:$0xf0] }
 0x10f   : > { %v1714_v19 = vmul.f32 %v3228_v4, %v1278_v38  ;;  %1230 = vmatmul.bf16.gmra.mxu2 %v3455_v60  ;;  %v3481_v60 = vor.u32 %v2602_v56, %v2273_v31 }
 0x110   : > { %1319 = vmatmul.bf16.gmra.mxu3 %v3457_v9 }
 0x111   : > { %v1784_v58 = vadd.f32 %v3230_v6, %v1714_v19  ;;  %v2600_v19 = vld [vmem:[%s2929_s9 + $0x1ec] sm:$0xf] }
 0x112   : > { %v1191_v61 = vpop.f32.mrf.mxu2  ;;  %v1015_v29 = vpop.f32.mrf.mxu0 }
 0x113   : > { %v1848_v62 = vmax.f32 %v1784_v58, 0.0  ;;  %v1192_v37 = vadd.f32 %v1191_v61, %v1103_v20  ;;  %v1280_v30 = vpop.f32.mrf.mxu3  ;;  %v1104_v41 = vpop.f32.mrf.mxu1  ;;  %v2275_v20 = vld [vmem:[%s2929_s9 + $0x1f8] sm:$0xf0]  ;;  %v3477_v61 = vor.u32 %v2601_v23, %v2265_v22 }
 0x114   : > { %v1105_v38 = vadd.f32 %v1104_v41, %v1015_v29  ;;  %v3483_v18 = vor.u32 %v2600_v19, %v2275_v20 }
 0x115   : > { %1912 = vst [vmem:[%s3259_s10 + $0xb0] sm:$0xff] %v1848_v62  ;;  %v1281_v63 = vadd.f32 %v1280_v30, %v1192_v37 }
 0x117   : > { %v1716_v28 = vmul.f32 %v3228_v4, %v1281_v63  ;;  %v3479_v63 = vor.u32 %v2599_v7, %v2267_v21 }
 0x119   : > { %v1786_v36 = vadd.f32 %v3230_v6, %v1716_v28 }
 0x11a   : > { %v1193_v58 = vpop.f32.mrf.mxu2  ;;  %v1018_v30 = vpop.f32.mrf.mxu0 }
 0x11b   : > { %v1850_v9 = vmax.f32 %v1786_v36, 0.0  ;;  %v1194_v62 = vadd.f32 %v1193_v58, %v1105_v38  ;;  %v1282_v37 = vpop.f32.mrf.mxu3  ;;  %v1107_v39 = vpop.f32.mrf.mxu1 }
 0x11c   : > { %v1108_v41 = vadd.f32 %v1107_v39, %v1018_v30 }
 0x11d   : > { %1914 = vst [vmem:[%s3259_s10 + $0xc0] sm:$0xff] %v1850_v9  ;;  %v1283_v28 = vadd.f32 %v1282_v37, %v1194_v62  ;;  %1057 = vmatmul.bf16.gmra.mxu0 %v3477_v61 }
 0x11e   : > { %1146 = vmatmul.bf16.gmra.mxu1 %v3479_v63 }
 0x11f   : > { %v1718_v29 = vmul.f32 %v3228_v4, %v1283_v28  ;;  %1235 = vmatmul.bf16.gmra.mxu2 %v3481_v60 }
 0x120   : > { %1324 = vmatmul.bf16.gmra.mxu3 %v3483_v18 }
 0x121   : > { %v1788_v22 = vadd.f32 %v3230_v6, %v1718_v29 }
 0x122   : > { %v1196_v23 = vpop.f32.mrf.mxu2  ;;  %v1020_v9 = vpop.f32.mrf.mxu0 }
 0x123   : > { %v1852_v7 = vmax.f32 %v1788_v22, 0.0  ;;  %v1197_v21 = vadd.f32 %v1196_v23, %v1108_v41  ;;  %v1285_v31 = vpop.f32.mrf.mxu3  ;;  %v1109_v56 = vpop.f32.mrf.mxu1 }
 0x124   : > { %v1110_v19 = vadd.f32 %v1109_v56, %v1020_v9 }
 0x125   : > { %1916 = vst [vmem:[%s3259_s10 + $0xd0] sm:$0xff] %v1852_v7  ;;  %v1286_v36 = vadd.f32 %v1285_v31, %v1197_v21 }
 0x127   : > { %v1720_v38 = vmul.f32 %v3228_v4, %v1286_v36 }
 0x129   : > { %v1790_v39 = vadd.f32 %v3230_v6, %v1720_v38 }
 0x12a   : > { %v1198_v20 = vpop.f32.mrf.mxu2  ;;  %v1023_v30 = vpop.f32.mrf.mxu0 }
 0x12b   : > { %v1854_v58 = vmax.f32 %v1790_v39, 0.0  ;;  %v1199_v62 = vadd.f32 %v1198_v20, %v1110_v19  ;;  %v1287_v37 = vpop.f32.mrf.mxu3  ;;  %v1112_v28 = vpop.f32.mrf.mxu1 }
 0x12c   : > { %v1113_v22 = vadd.f32 %v1112_v28, %v1023_v30 }
 0x12d   : > { %1918 = vst [vmem:[%s3259_s10 + $0xe0] sm:$0xff] %v1854_v58  ;;  %v1288_v29 = vadd.f32 %v1287_v37, %v1199_v62  ;;  %1338 = vmatmul.bf16.vlgmr.msrb.gmra.mxu0 %v2949_v46 }
 0x12e   : > { %1427 = vmatmul.bf16.vlgmr.msrb.gmra.mxu1 %v2956_v51 }
 0x12f   : > { %v1722_v41 = vmul.f32 %v3228_v4, %v1288_v29  ;;  %1516 = vmatmul.bf16.vlgmr.msrb.gmra.mxu2 %v2958_v52 }
 0x130   : > { %1605 = vmatmul.bf16.vlgmr.msrb.gmra.mxu3 %v2960_v53 }
 0x131   : > { %v1792_v23 = vadd.f32 %v3230_v6, %v1722_v41 }
 0x132   : > { %v1201_v7 = vpop.f32.mrf.mxu2  ;;  %v1025_v56 = vpop.f32.mrf.mxu0 }
 0x133   : > { %v1856_v21 = vmax.f32 %v1792_v23, 0.0  ;;  %v1202_v31 = vadd.f32 %v1201_v7, %v1113_v22  ;;  %v1290_v9 = vpop.f32.mrf.mxu3  ;;  %v1114_v36 = vpop.f32.mrf.mxu1 }
 0x134   : > { %v1115_v51 = vadd.f32 %v1114_v36, %v1025_v56 }
 0x135   : > { %1920 = vst [vmem:[%s3259_s10 + $0xf0] sm:$0xff] %v1856_v21  ;;  %v1291_v46 = vadd.f32 %v1290_v9, %v1202_v31 }
 0x137   : > { %v1724_v38 = vmul.f32 %v3228_v4, %v1291_v46 }
 0x139   : > { %v1794_v39 = vadd.f32 %v3230_v6, %v1724_v38 }
 0x13a   : > { %v1203_v19 = vpop.f32.mrf.mxu2  ;;  %v1028_v58 = vpop.f32.mrf.mxu0 }
 0x13b   : > { %v1858_v52 = vmax.f32 %v1794_v39, 0.0  ;;  %v1204_v20 = vadd.f32 %v1203_v19, %v1115_v51  ;;  %v1292_v53 = vpop.f32.mrf.mxu3  ;;  %v1117_v62 = vpop.f32.mrf.mxu1 }
 0x13c   : > { %v1118_v28 = vadd.f32 %v1117_v62, %v1028_v58 }
 0x13d   : > { %1922 = vst [vmem:[%s3259_s10 + $0x100] sm:$0xff] %v1858_v52  ;;  %v1293_v37 = vadd.f32 %v1292_v53, %v1204_v20  ;;  %1343 = vmatmul.bf16.gmra.mxu0 %v2998_v12 }
 0x13e   : > { %1432 = vmatmul.bf16.gmra.mxu1 %v3000_v13 }
 0x13f   : > { %v1726_v30 = vmul.f32 %v3228_v4, %v1293_v37  ;;  %1521 = vmatmul.bf16.gmra.mxu2 %v3002_v14 }
 0x140   : > { %1610 = vmatmul.bf16.gmra.mxu3 %v3004_v15 }
 0x141   : > { %v1796_v29 = vadd.f32 %v3230_v6, %v1726_v30 }
 0x142   : > { %v1206_v41 = vpop.f32.mrf.mxu2  ;;  %v1030_v21 = vpop.f32.mrf.mxu0 }
 0x143   : > { %v1860_v22 = vmax.f32 %v1796_v29, 0.0  ;;  %v1207_v23 = vadd.f32 %v1206_v41, %v1118_v28  ;;  %v1295_v7 = vpop.f32.mrf.mxu3  ;;  %v1119_v31 = vpop.f32.mrf.mxu1 }
 0x144   : > { %v1120_v13 = vadd.f32 %v1119_v31, %v1030_v21 }
 0x145   : > { %1924 = vst [vmem:[%s3259_s10 + $0x110] sm:$0xff] %v1860_v22  ;;  %v1296_v12 = vadd.f32 %v1295_v7, %v1207_v23 }
 0x147   : > { %v1728_v9 = vmul.f32 %v3228_v4, %v1296_v12 }
 0x149   : > { %v1798_v56 = vadd.f32 %v3230_v6, %v1728_v9 }
 0x14a   : > { %v1208_v36 = vpop.f32.mrf.mxu2  ;;  %v1033_v38 = vpop.f32.mrf.mxu0 }
 0x14b   : > { %v1862_v14 = vmax.f32 %v1798_v56, 0.0  ;;  %v1209_v46 = vadd.f32 %v1208_v36, %v1120_v13  ;;  %v1297_v15 = vpop.f32.mrf.mxu3  ;;  %v1122_v39 = vpop.f32.mrf.mxu1 }
 0x14c   : > { %v1123_v52 = vadd.f32 %v1122_v39, %v1033_v38 }
 0x14d   : > { %1926 = vst [vmem:[%s3259_s10 + $0x120] sm:$0xff] %v1862_v14  ;;  %v1298_v51 = vadd.f32 %v1297_v15, %v1209_v46  ;;  %1348 = vmatmul.bf16.gmra.mxu0 %v3018_v24 }
 0x14e   : > { %1437 = vmatmul.bf16.gmra.mxu1 %v3020_v25 }
 0x14f   : > { %v1730_v19 = vmul.f32 %v3228_v4, %v1298_v51  ;;  %1526 = vmatmul.bf16.gmra.mxu2 %v3022_v26 }
 0x150   : > { %1615 = vmatmul.bf16.gmra.mxu3 %v3024_v27 }
 0x151   : > { %v1800_v20 = vadd.f32 %v3230_v6, %v1730_v19 }
 0x152   : > { %v1211_v53 = vpop.f32.mrf.mxu2  ;;  %v1035_v30 = vpop.f32.mrf.mxu0 }
 0x153   : > { %v1864_v58 = vmax.f32 %v1800_v20, 0.0  ;;  %v1212_v62 = vadd.f32 %v1211_v53, %v1123_v52  ;;  %v1300_v37 = vpop.f32.mrf.mxu3  ;;  %v1124_v28 = vpop.f32.mrf.mxu1 }
 0x154   : > { %v1125_v25 = vadd.f32 %v1124_v28, %v1035_v30 }
 0x155   : > { %1928 = vst [vmem:[%s3259_s10 + $0x130] sm:$0xff] %v1864_v58  ;;  %v1301_v24 = vadd.f32 %v1300_v37, %v1212_v62 }
 0x157   : > { %v1732_v29 = vmul.f32 %v3228_v4, %v1301_v24 }
 0x159   : > { %v1802_v41 = vadd.f32 %v3230_v6, %v1732_v29 }
 0x15a   : > { %v1213_v22 = vpop.f32.mrf.mxu2  ;;  %v1038_v7 = vpop.f32.mrf.mxu0 }
 0x15b   : > { %v1866_v26 = vmax.f32 %v1802_v41, 0.0  ;;  %v1214_v23 = vadd.f32 %v1213_v22, %v1125_v25  ;;  %v1302_v27 = vpop.f32.mrf.mxu3  ;;  %v1127_v21 = vpop.f32.mrf.mxu1 }
 0x15c   : > { %v1128_v9 = vadd.f32 %v1127_v21, %v1038_v7 }
 0x15d   : > { %1930 = vst [vmem:[%s3259_s10 + $0x140] sm:$0xff] %v1866_v26  ;;  %v1303_v31 = vadd.f32 %v1302_v27, %v1214_v23  ;;  %1353 = vmatmul.bf16.gmra.mxu0 %v3062_v49 }
 0x15e   : > { %1442 = vmatmul.bf16.gmra.mxu1 %v3064_v50 }
 0x15f   : > { %v1734_v12 = vmul.f32 %v3228_v4, %v1303_v31  ;;  %1531 = vmatmul.bf16.gmra.mxu2 %v3066_v54 }
 0x160   : > { %1620 = vmatmul.bf16.gmra.mxu3 %v3068_v55 }
 0x161   : > { %v1804_v56 = vadd.f32 %v3230_v6, %v1734_v12 }
 0x162   : > { %v1216_v13 = vpop.f32.mrf.mxu2  ;;  %v1040_v15 = vpop.f32.mrf.mxu0 }
 0x163   : > { %v1868_v36 = vmax.f32 %v1804_v56, 0.0  ;;  %v1217_v14 = vadd.f32 %v1216_v13, %v1128_v9  ;;  %v1305_v46 = vpop.f32.mrf.mxu3  ;;  %v1129_v38 = vpop.f32.mrf.mxu1 }
 0x164   : > { %v1130_v50 = vadd.f32 %v1129_v38, %v1040_v15 }
 0x165   : > { %1932 = vst [vmem:[%s3259_s10 + $0x150] sm:$0xff] %v1868_v36  ;;  %v1306_v49 = vadd.f32 %v1305_v46, %v1217_v14 }
 0x167   : > { %v1736_v39 = vmul.f32 %v3228_v4, %v1306_v49 }
 0x169   : > { %v1806_v51 = vadd.f32 %v3230_v6, %v1736_v39 }
 0x16a   : > { %v1218_v19 = vpop.f32.mrf.mxu2  ;;  %v1043_v20 = vpop.f32.mrf.mxu0 }
 0x16b   : > { %v1870_v54 = vmax.f32 %v1806_v51, 0.0  ;;  %v1219_v52 = vadd.f32 %v1218_v19, %v1130_v50  ;;  %v1307_v55 = vpop.f32.mrf.mxu3  ;;  %v1132_v53 = vpop.f32.mrf.mxu1 }
 0x16c   : > { %v1133_v37 = vadd.f32 %v1132_v53, %v1043_v20 }
 0x16d   : > { %1934 = vst [vmem:[%s3259_s10 + $0x160] sm:$0xff] %v1870_v54  ;;  %v1308_v58 = vadd.f32 %v1307_v55, %v1219_v52  ;;  %1358 = vmatmul.bf16.gmra.mxu0 %v3082_v0 }
 0x16e   : > { %1447 = vmatmul.bf16.gmra.mxu1 %v3084_v1 }
 0x16f   : > { %v1738_v62 = vmul.f32 %v3228_v4, %v1308_v58  ;;  %1536 = vmatmul.bf16.gmra.mxu2 %v3086_v2 }
 0x170   : > { %1625 = vmatmul.bf16.gmra.mxu3 %v3088_v3 }
 0x171   : > { %v1808_v30 = vadd.f32 %v3230_v6, %v1738_v62 }
 0x172   : > { %v1221_v28 = vpop.f32.mrf.mxu2  ;;  %v1045_v25 = vpop.f32.mrf.mxu0 }
 0x173   : > { %v1872_v24 = vmax.f32 %v1808_v30, 0.0  ;;  %v1222_v29 = vadd.f32 %v1221_v28, %v1133_v37  ;;  %v1310_v41 = vpop.f32.mrf.mxu3  ;;  %v1134_v22 = vpop.f32.mrf.mxu1 }
 0x174   : > { %v1135_v1 = vadd.f32 %v1134_v22, %v1045_v25 }
 0x175   : > { %1936 = vst [vmem:[%s3259_s10 + $0x170] sm:$0xff] %v1872_v24  ;;  %v1311_v0 = vadd.f32 %v1310_v41, %v1222_v29 }
 0x177   : > { %v1740_v26 = vmul.f32 %v3228_v4, %v1311_v0 }
 0x179   : > { %v1810_v23 = vadd.f32 %v3230_v6, %v1740_v26 }
 0x17a   : > { %v1223_v27 = vpop.f32.mrf.mxu2  ;;  %v1048_v21 = vpop.f32.mrf.mxu0 }
 0x17b   : > { %v1874_v2 = vmax.f32 %v1810_v23, 0.0  ;;  %v1224_v7 = vadd.f32 %v1223_v27, %v1135_v1  ;;  %v1312_v3 = vpop.f32.mrf.mxu3  ;;  %v1137_v31 = vpop.f32.mrf.mxu1 }
 0x17c   : > { %v1138_v56 = vadd.f32 %v1137_v31, %v1048_v21 }
 0x17d   : > { %1938 = vst [vmem:[%s3259_s10 + $0x180] sm:$0xff] %v1874_v2  ;;  %v1313_v12 = vadd.f32 %v1312_v3, %v1224_v7  ;;  %1363 = vmatmul.bf16.gmra.mxu0 %v3126_v32 }
 0x17e   : > { %1452 = vmatmul.bf16.gmra.mxu1 %v3128_v33 }
 0x17f   : > { %v1742_v9 = vmul.f32 %v3228_v4, %v1313_v12  ;;  %1541 = vmatmul.bf16.gmra.mxu2 %v3130_v34 }
 0x180   : > { %1630 = vmatmul.bf16.gmra.mxu3 %v3132_v35 }
 0x181   : > { %v1812_v13 = vadd.f32 %v3230_v6, %v1742_v9 }
 0x182   : > { %v1226_v36 = vpop.f32.mrf.mxu2  ;;  %v1050_v38 = vpop.f32.mrf.mxu0 }
 0x183   : > { %v1876_v14 = vmax.f32 %v1812_v13, 0.0  ;;  %v1227_v46 = vadd.f32 %v1226_v36, %v1138_v56  ;;  %v1315_v15 = vpop.f32.mrf.mxu3  ;;  %v1139_v49 = vpop.f32.mrf.mxu1 }
 0x184   : > { %v1140_v33 = vadd.f32 %v1139_v49, %v1050_v38 }
 0x185   : > { %1940 = vst [vmem:[%s3259_s10 + $0x190] sm:$0xff] %v1876_v14  ;;  %v1316_v32 = vadd.f32 %v1315_v15, %v1227_v46 }
 0x187   : > { %v1744_v39 = vmul.f32 %v3228_v4, %v1316_v32 }
 0x189   : > { %v1814_v51 = vadd.f32 %v3230_v6, %v1744_v39 }
 0x18a   : > { %v1228_v50 = vpop.f32.mrf.mxu2  ;;  %v1053_v54 = vpop.f32.mrf.mxu0 }
 0x18b   : > { %v1878_v34 = vmax.f32 %v1814_v51, 0.0  ;;  %v1229_v19 = vadd.f32 %v1228_v50, %v1140_v33  ;;  %v1317_v35 = vpop.f32.mrf.mxu3  ;;  %v1142_v52 = vpop.f32.mrf.mxu1 }
 0x18c   : > { %v1143_v53 = vadd.f32 %v1142_v52, %v1053_v54 }
 0x18d   : > { %1942 = vst [vmem:[%s3259_s10 + $0x1a0] sm:$0xff] %v1878_v34  ;;  %v1318_v55 = vadd.f32 %v1317_v35, %v1229_v19  ;;  %1368 = vmatmul.bf16.gmra.mxu0 %v3146_v44  ;;  %v2675_v35 = vld [vmem:[%s3722_s2] sm:$0x3] }
 0x18e   : > { %1457 = vmatmul.bf16.gmra.mxu1 %v3148_v45 }
 0x18f   : > { %v1746_v20 = vmul.f32 %v3228_v4, %v1318_v55  ;;  %1546 = vmatmul.bf16.gmra.mxu2 %v3150_v47 }
 0x190   : > { %1635 = vmatmul.bf16.gmra.mxu3 %v3152_v48 }
 0x191   : > { %v1816_v58 = vadd.f32 %v3230_v6, %v1746_v20 }
 0x192   : > { %v1231_v62 = vpop.f32.mrf.mxu2  ;;  %v1055_v24 = vpop.f32.mrf.mxu0 }
 0x193   : > { %v1880_v37 = vmax.f32 %v1816_v58, 0.0  ;;  %v1232_v30 = vadd.f32 %v1231_v62, %v1143_v53  ;;  %v1320_v28 = vpop.f32.mrf.mxu3  ;;  %v1144_v29 = vpop.f32.mrf.mxu1 }
 0x194   : > { %v1145_v45 = vadd.f32 %v1144_v29, %v1055_v24 }
 0x195   : > { %1944 = vst [vmem:[%s3259_s10 + $0x1b0] sm:$0xff] %v1880_v37  ;;  %v1321_v44 = vadd.f32 %v1320_v28, %v1232_v30 }
 0x197   : > { %v1748_v41 = vmul.f32 %v3228_v4, %v1321_v44  ;;  %v3767_v44 = vld [vmem:[#allocation2_spill] sm:$0xff] }
 0x199   : > { %v1818_v25 = vadd.f32 %v3230_v6, %v1748_v41  ;;  %v3768_v41 = vld [vmem:[#allocation3_spill] sm:$0xff] }
 0x19a   : > { %v1233_v22 = vpop.f32.mrf.mxu2  ;;  %v1058_v26 = vpop.f32.mrf.mxu0 }
 0x19b   : > { %v1882_v47 = vmax.f32 %v1818_v25, 0.0  ;;  %v1234_v0 = vadd.f32 %v1233_v22, %v1145_v45  ;;  %v1322_v48 = vpop.f32.mrf.mxu3  ;;  %v1147_v23 = vpop.f32.mrf.mxu1 }
 0x19c   : > { %v1148_v2 = vadd.f32 %v1147_v23, %v1058_v26 }
 0x19d   : > { %1946 = vst [vmem:[%s3259_s10 + $0x1c0] sm:$0xff] %v1882_v47  ;;  %v1323_v1 = vadd.f32 %v1322_v48, %v1234_v0  ;;  %1373 = vmatmul.bf16.gmra.mxu0 %v3178_v10 }
 0x19e   : > { %1462 = vmatmul.bf16.gmra.mxu1 %v3180_v11 }
 0x19f   : > { %v1750_v27 = vmul.f32 %v3228_v4, %v1323_v1  ;;  %1551 = vmatmul.bf16.gmra.mxu2 %v3182_v16 }
 0x1a0   : > { %1640 = vmatmul.bf16.gmra.mxu3 %v3184_v17 }
 0x1a1   : > { %v1820_v7 = vadd.f32 %v3230_v6, %v1750_v27 }
 0x1a2   : > { %v1236_v3 = vpop.f32.mrf.mxu2  ;;  %v1060_v9 = vpop.f32.mrf.mxu0 }
 0x1a3   : > { %v1884_v21 = vmax.f32 %v1820_v7, 0.0  ;;  %v1237_v31 = vadd.f32 %v1236_v3, %v1148_v2  ;;  %v1325_v12 = vpop.f32.mrf.mxu3  ;;  %v1149_v56 = vpop.f32.mrf.mxu1 }
 0x1a4   : > { %v1150_v11 = vadd.f32 %v1149_v56, %v1060_v9  ;;  %v3769_v9 = vld [vmem:[#allocation4_spill] sm:$0xff] }
 0x1a5   : > { %1948 = vst [vmem:[%s3259_s10 + $0x1d0] sm:$0xff] %v1884_v21  ;;  %v1326_v10 = vadd.f32 %v1325_v12, %v1237_v31 }
 0x1a7   : > { %v1752_v13 = vmul.f32 %v3228_v4, %v1326_v10 }
 0x1a9   : > { %v1822_v36 = vadd.f32 %v3230_v6, %v1752_v13  ;;  %v3770_v13 = vld [vmem:[#allocation5_spill] sm:$0xff] }
 0x1aa   : > { %v1238_v14 = vpop.f32.mrf.mxu2  ;;  %v1339_v15 = vpop.f32.mrf.mxu0 }
 0x1ab   : > { %v1886_v16 = vmax.f32 %v1822_v36, 0.0  ;;  %v1239_v46 = vadd.f32 %v1238_v14, %v1150_v11  ;;  %v1327_v17 = vpop.f32.mrf.mxu3  ;;  %v1428_v38 = vpop.f32.mrf.mxu1  ;;  %v3771_v36 = vld [vmem:[#allocation6_spill] sm:$0xff]  ;;  %v3772_v11 = vld [vmem:[#allocation7_spill] sm:$0xff] }
 0x1ac   : > { %v1429_v39 = vadd.f32 %v1428_v38, %v1339_v15 }
 0x1ad   : > { %1950 = vst [vmem:[%s3259_s10 + $0x1e0] sm:$0xff] %v1886_v16  ;;  %v1328_v49 = vadd.f32 %v1327_v17, %v1239_v46  ;;  %1378 = vmatmul.bf16.gmra.mxu0 %v3210_v40  ;;  %v3585_v40 = vperm.slane %v2675_v35, 1 }
 0x1ae   : > { %1467 = vmatmul.bf16.gmra.mxu1 %v3212_v42 }
 0x1af   : > { %v1754_v32 = vmul.f32 %v3228_v4, %v1328_v49  ;;  %1556 = vmatmul.bf16.gmra.mxu2 %v3214_v43  ;;  %v2676_v43 = vld [vmem:[%s3723_s3] sm:$0x3] }
 0x1b0   : > { %1645 = vmatmul.bf16.gmra.mxu3 %v3216_v57  ;;  %v3591_v57 = vperm.slane %v2676_v43, 1  ;;  %v3773_v43 = vld [vmem:[#allocation8_spill] sm:$0xff] }
 0x1b1   : > { %v1824_v51 = vadd.f32 %v3230_v6, %v1754_v32 }
 0x1b2   : > { %v1517_v33 = vpop.f32.mrf.mxu2  ;;  %v1341_v4 = vpop.f32.mrf.mxu0 }
 0x1b3   : > { %v1888_v50 = vmax.f32 %v1824_v51, 0.0  ;;  %v1518_v34 = vadd.f32 %v1517_v33, %v1429_v39  ;;  %v1606_v19 = vpop.f32.mrf.mxu3  ;;  %v1430_v54 = vpop.f32.mrf.mxu1 }
 0x1b4   : > { %v1431_v55 = vadd.f32 %v1430_v54, %v1341_v4 }
 0x1b5   : > { %1952 = vst [vmem:[%s3259_s10 + $0x1f0] sm:$0xff] %v1888_v50  ;;  %v1607_v42 = vadd.f32 %v1606_v19, %v1518_v34 }
 0x1b7   : > { %v1693_v6 = vmul.f32 %v3585_v40, %v1607_v42 }
 0x1b9   : > { %v1763_v52 = vadd.f32 %v3591_v57, %v1693_v6 }
 0x1ba   : > { %v1519_v20 = vpop.f32.mrf.mxu2  ;;  %v1344_v37 = vpop.f32.mrf.mxu0 }
 0x1bb   : > { %v1827_v53 = vmax.f32 %v1763_v52, 0.0  ;;  %v1520_v58 = vadd.f32 %v1519_v20, %v1431_v55  ;;  %v1608_v62 = vpop.f32.mrf.mxu3  ;;  %v1433_v30 = vpop.f32.mrf.mxu1  ;;  %v3774_v55 = vld [vmem:[#allocation9_spill] sm:$0xff]  ;;  %v3775_v20 = vld [vmem:[#allocation10_spill] sm:$0xff] }
 0x1bc   : > { %v1434_v29 = vadd.f32 %v1433_v30, %v1344_v37 }
 0x1bd   : > { %1891 = vst [vmem:[%s3259_s10 + $0x8] sm:$0xff] %v1827_v53  ;;  %v1609_v28 = vadd.f32 %v1608_v62, %v1520_v58  ;;  %1383 = vmatmul.bf16.gmra.mxu0 %v3261_v59  ;;  %v3776_v53 = vld [vmem:[#allocation11_spill] sm:$0xff] }
 0x1be   : > { %1472 = vmatmul.bf16.gmra.mxu1 %v3263_v8 }
 0x1bf   : > { %v1695_v24 = vmul.f32 %v3585_v40, %v1609_v28  ;;  %1561 = vmatmul.bf16.gmra.mxu2 %v3767_v44 }
 0x1c0   : > { %1650 = vmatmul.bf16.gmra.mxu3 %v3768_v41 }
 0x1c1   : > { %v1765_v25 = vadd.f32 %v3591_v57, %v1695_v24 }
 0x1c2   : > { %v1522_v45 = vpop.f32.mrf.mxu2  ;;  %v1346_v48 = vpop.f32.mrf.mxu0 }
 0x1c3   : > { %v1829_v22 = vmax.f32 %v1765_v25, 0.0  ;;  %v1523_v47 = vadd.f32 %v1522_v45, %v1434_v29  ;;  %v1611_v0 = vpop.f32.mrf.mxu3  ;;  %v1435_v26 = vpop.f32.mrf.mxu1 }
 0x1c4   : > { %v1436_v8 = vadd.f32 %v1435_v26, %v1346_v48 }
 0x1c5   : > { %1893 = vst [vmem:[%s3259_s10 + $0x18] sm:$0xff] %v1829_v22  ;;  %v1612_v59 = vadd.f32 %v1611_v0, %v1523_v47 }
 0x1c7   : > { %v1697_v23 = vmul.f32 %v3585_v40, %v1612_v59 }
 0x1c9   : > { %v1767_v1 = vadd.f32 %v3591_v57, %v1697_v23 }
 0x1ca   : > { %v1524_v27 = vpop.f32.mrf.mxu2  ;;  %v1349_v21 = vpop.f32.mrf.mxu0 }
 0x1cb   : > { %v1831_v2 = vmax.f32 %v1767_v1, 0.0  ;;  %v1525_v7 = vadd.f32 %v1524_v27, %v1436_v8  ;;  %v1613_v3 = vpop.f32.mrf.mxu3  ;;  %v1438_v31 = vpop.f32.mrf.mxu1  ;;  %v3777_v1 = vld [vmem:[#allocation12_spill] sm:$0xff] }
 0x1cc   : > { %v1439_v10 = vadd.f32 %v1438_v31, %v1349_v21 }
 0x1cd   : > { %1895 = vst [vmem:[%s3259_s10 + $0x28] sm:$0xff] %v1831_v2  ;;  %v1614_v12 = vadd.f32 %v1613_v3, %v1525_v7  ;;  %1388 = vmatmul.bf16.gmra.mxu0 %v3769_v9  ;;  %v3778_v2 = vld [vmem:[#allocation13_spill] sm:$0xff]  ;;  %v3779_v7 = vld [vmem:[#allocation14_spill] sm:$0xff]  ;;  %v3780_v3 = vld [vmem:[#allocation15_spill] sm:$0xff] }
 0x1ce   : > { %1477 = vmatmul.bf16.gmra.mxu1 %v3770_v13 }
 0x1cf   : > { %v1699_v56 = vmul.f32 %v3585_v40, %v1614_v12  ;;  %1566 = vmatmul.bf16.gmra.mxu2 %v3771_v36 }
 0x1d0   : > { %1655 = vmatmul.bf16.gmra.mxu3 %v3772_v11 }
 0x1d1   : > { %v1769_v14 = vadd.f32 %v3591_v57, %v1699_v56 }
 0x1d2   : > { %v1527_v16 = vpop.f32.mrf.mxu2  ;;  %v1351_v38 = vpop.f32.mrf.mxu0 }
 0x1d3   : > { %v1833_v46 = vmax.f32 %v1769_v14, 0.0  ;;  %v1528_v17 = vadd.f32 %v1527_v16, %v1439_v10  ;;  %v1616_v15 = vpop.f32.mrf.mxu3  ;;  %v1440_v49 = vpop.f32.mrf.mxu1 }
 0x1d4   : > { %v1441_v33 = vadd.f32 %v1440_v49, %v1351_v38 }
 0x1d5   : > { %1897 = vst [vmem:[%s3259_s10 + $0x38] sm:$0xff] %v1833_v46  ;;  %v1617_v32 = vadd.f32 %v1616_v15, %v1528_v17 }
 0x1d7   : > { %v1701_v39 = vmul.f32 %v3585_v40, %v1617_v32 }
 0x1d9   : > { %v1771_v51 = vadd.f32 %v3591_v57, %v1701_v39 }
 0x1da   : > { %v1529_v50 = vpop.f32.mrf.mxu2  ;;  %v1354_v4 = vpop.f32.mrf.mxu0 }
 0x1db   : > { %v1835_v34 = vmax.f32 %v1771_v51, 0.0  ;;  %v1530_v19 = vadd.f32 %v1529_v50, %v1441_v33  ;;  %v1618_v35 = vpop.f32.mrf.mxu3  ;;  %v1443_v54 = vpop.f32.mrf.mxu1  ;;  %v3781_v50 = vld [vmem:[#allocation16_spill] sm:$0xff] }
 0x1dc   : > { %v1444_v52 = vadd.f32 %v1443_v54, %v1354_v4 }
 0x1dd   : > { %1899 = vst [vmem:[%s3259_s10 + $0x48] sm:$0xff] %v1835_v34  ;;  %v1619_v42 = vadd.f32 %v1618_v35, %v1530_v19  ;;  %1393 = vmatmul.bf16.gmra.mxu0 %v3773_v43  ;;  %v3782_v34 = vld [vmem:[#allocation17_spill] sm:$0xff]  ;;  %v3783_v19 = vld [vmem:[#allocation18_spill] sm:$0xff] }
 0x1de   : > { %1482 = vmatmul.bf16.gmra.mxu1 %v3774_v55 }
 0x1df   : > { %v1703_v6 = vmul.f32 %v3585_v40, %v1619_v42  ;;  %1571 = vmatmul.bf16.gmra.mxu2 %v3775_v20 }
 0x1e0   : > { %1660 = vmatmul.bf16.gmra.mxu3 %v3776_v53 }
 0x1e1   : > { %v1773_v58 = vadd.f32 %v3591_v57, %v1703_v6 }
 0x1e2   : > { %v1532_v62 = vpop.f32.mrf.mxu2  ;;  %v1356_v24 = vpop.f32.mrf.mxu0 }
 0x1e3   : > { %v1837_v37 = vmax.f32 %v1773_v58, 0.0  ;;  %v1533_v30 = vadd.f32 %v1532_v62, %v1444_v52  ;;  %v1621_v28 = vpop.f32.mrf.mxu3  ;;  %v1445_v29 = vpop.f32.mrf.mxu1 }
 0x1e4   : > { %v1446_v45 = vadd.f32 %v1445_v29, %v1356_v24 }
 0x1e5   : > { %1901 = vst [vmem:[%s3259_s10 + $0x58] sm:$0xff] %v1837_v37  ;;  %v1622_v44 = vadd.f32 %v1621_v28, %v1533_v30 }
 0x1e7   : > { %v1705_v41 = vmul.f32 %v3585_v40, %v1622_v44  ;;  %v3784_v44 = vld [vmem:[#allocation19_spill] sm:$0xff] }
 0x1e9   : > { %v1775_v25 = vadd.f32 %v3591_v57, %v1705_v41 }
 0x1ea   : > { %v1534_v22 = vpop.f32.mrf.mxu2  ;;  %v1359_v26 = vpop.f32.mrf.mxu0 }
 0x1eb   : > { %v1839_v47 = vmax.f32 %v1775_v25, 0.0  ;;  %v1535_v0 = vadd.f32 %v1534_v22, %v1446_v45  ;;  %v1623_v48 = vpop.f32.mrf.mxu3  ;;  %v1448_v59 = vpop.f32.mrf.mxu1  ;;  %v3785_v45 = vld [vmem:[#allocation20_spill] sm:$0xff]  ;;  %v3786_v22 = vld [vmem:[#allocation21_spill] sm:$0xff] }
 0x1ec   : > { %v1449_v27 = vadd.f32 %v1448_v59, %v1359_v26 }
 0x1ed   : > { %1903 = vst [vmem:[%s3259_s10 + $0x68] sm:$0xff] %v1839_v47  ;;  %v1624_v23 = vadd.f32 %v1623_v48, %v1535_v0  ;;  %1398 = vmatmul.bf16.gmra.mxu0 %v3777_v1  ;;  %v3787_v47 = vld [vmem:[#allocation22_spill] sm:$0xff] }
 0x1ee   : > { %1487 = vmatmul.bf16.gmra.mxu1 %v3778_v2 }
 0x1ef   : > { %v1707_v8 = vmul.f32 %v3585_v40, %v1624_v23  ;;  %1576 = vmatmul.bf16.gmra.mxu2 %v3779_v7 }
 0x1f0   : > { %1665 = vmatmul.bf16.gmra.mxu3 %v3780_v3 }
 0x1f1   : > { %v1777_v21 = vadd.f32 %v3591_v57, %v1707_v8 }
 0x1f2   : > { %v1537_v31 = vpop.f32.mrf.mxu2  ;;  %v1361_v10 = vpop.f32.mrf.mxu0 }
 0x1f3   : > { %v1841_v12 = vmax.f32 %v1777_v21, 0.0  ;;  %v1538_v9 = vadd.f32 %v1537_v31, %v1449_v27  ;;  %v1626_v56 = vpop.f32.mrf.mxu3  ;;  %v1450_v13 = vpop.f32.mrf.mxu1 }
 0x1f4   : > { %v1451_v16 = vadd.f32 %v1450_v13, %v1361_v10 }
 0x1f5   : > { %1905 = vst [vmem:[%s3259_s10 + $0x78] sm:$0xff] %v1841_v12  ;;  %v1627_v36 = vadd.f32 %v1626_v56, %v1538_v9 }
 0x1f7   : > { %v1709_v11 = vmul.f32 %v3585_v40, %v1627_v36 }
 0x1f9   : > { %v1779_v14 = vadd.f32 %v3591_v57, %v1709_v11 }
 0x1fa   : > { %v1539_v46 = vpop.f32.mrf.mxu2  ;;  %v1364_v49 = vpop.f32.mrf.mxu0 }
 0x1fb   : > { %v1843_v17 = vmax.f32 %v1779_v14, 0.0  ;;  %v1540_v15 = vadd.f32 %v1539_v46, %v1451_v16  ;;  %v1628_v38 = vpop.f32.mrf.mxu3  ;;  %v1453_v32 = vpop.f32.mrf.mxu1 }
 0x1fc   : > { %v1454_v33 = vadd.f32 %v1453_v32, %v1364_v49 }
 0x1fd   : > { %1907 = vst [vmem:[%s3259_s10 + $0x88] sm:$0xff] %v1843_v17  ;;  %v1629_v39 = vadd.f32 %v1628_v38, %v1540_v15  ;;  %1403 = vmatmul.bf16.gmra.mxu0 %v3413_v5 }
 0x1fe   : > { %1492 = vmatmul.bf16.gmra.mxu1 %v3781_v50 }
 0x1ff   : > { %v1711_v51 = vmul.f32 %v3585_v40, %v1629_v39  ;;  %1581 = vmatmul.bf16.gmra.mxu2 %v3782_v34 }
 0x200   : > { %1670 = vmatmul.bf16.gmra.mxu3 %v3783_v19 }
 0x201   : > { %v1781_v35 = vadd.f32 %v3591_v57, %v1711_v51 }
 0x202   : > { %v1542_v4 = vpop.f32.mrf.mxu2  ;;  %v1366_v6 = vpop.f32.mrf.mxu0 }
 0x203   : > { %v1845_v54 = vmax.f32 %v1781_v35, 0.0  ;;  %v1543_v42 = vadd.f32 %v1542_v4, %v1454_v33  ;;  %v1631_v43 = vpop.f32.mrf.mxu3  ;;  %v1455_v52 = vpop.f32.mrf.mxu1 }
 0x204   : > { %v1456_v53 = vadd.f32 %v1455_v52, %v1366_v6 }
 0x205   : > { %1909 = vst [vmem:[%s3259_s10 + $0x98] sm:$0xff] %v1845_v54  ;;  %v1632_v5 = vadd.f32 %v1631_v43, %v1543_v42 }
 0x207   : > { %v1713_v55 = vmul.f32 %v3585_v40, %v1632_v5 }
 0x209   : > { %v1783_v20 = vadd.f32 %v3591_v57, %v1713_v55 }
 0x20a   : > { %v1544_v58 = vpop.f32.mrf.mxu2  ;;  %v1369_v28 = vpop.f32.mrf.mxu0 }
 0x20b   : > { %v1847_v62 = vmax.f32 %v1783_v20, 0.0  ;;  %v1545_v37 = vadd.f32 %v1544_v58, %v1456_v53  ;;  %v1633_v30 = vpop.f32.mrf.mxu3  ;;  %v1458_v24 = vpop.f32.mrf.mxu1 }
 0x20c   : > { %v1459_v25 = vadd.f32 %v1458_v24, %v1369_v28 }
 0x20d   : > { %1911 = vst [vmem:[%s3259_s10 + $0xa8] sm:$0xff] %v1847_v62  ;;  %v1634_v29 = vadd.f32 %v1633_v30, %v1545_v37  ;;  %1408 = vmatmul.bf16.gmra.mxu0 %v3784_v44 }
 0x20e   : > { %1497 = vmatmul.bf16.gmra.mxu1 %v3785_v45 }
 0x20f   : > { %v1715_v41 = vmul.f32 %v3585_v40, %v1634_v29  ;;  %1586 = vmatmul.bf16.gmra.mxu2 %v3786_v22 }
 0x210   : > { %1675 = vmatmul.bf16.gmra.mxu3 %v3787_v47 }
 0x211   : > { %v1785_v0 = vadd.f32 %v3591_v57, %v1715_v41 }
 0x212   : > { %v1547_v48 = vpop.f32.mrf.mxu2  ;;  %v1371_v1 = vpop.f32.mrf.mxu0 }
 0x213   : > { %v1849_v26 = vmax.f32 %v1785_v0, 0.0  ;;  %v1548_v59 = vadd.f32 %v1547_v48, %v1459_v25  ;;  %v1636_v23 = vpop.f32.mrf.mxu3  ;;  %v1460_v8 = vpop.f32.mrf.mxu1 }
 0x214   : > { %v1461_v3 = vadd.f32 %v1460_v8, %v1371_v1 }
 0x215   : > { %1913 = vst [vmem:[%s3259_s10 + $0xb8] sm:$0xff] %v1849_v26  ;;  %v1637_v27 = vadd.f32 %v1636_v23, %v1548_v59 }
 0x217   : > { %v1717_v2 = vmul.f32 %v3585_v40, %v1637_v27 }
 0x219   : > { %v1787_v7 = vadd.f32 %v3591_v57, %v1717_v2 }
 0x21a   : > { %v1549_v21 = vpop.f32.mrf.mxu2  ;;  %v1374_v56 = vpop.f32.mrf.mxu0 }
 0x21b   : > { %v1851_v31 = vmax.f32 %v1787_v7, 0.0  ;;  %v1550_v12 = vadd.f32 %v1549_v21, %v1461_v3  ;;  %v1638_v9 = vpop.f32.mrf.mxu3  ;;  %v1463_v10 = vpop.f32.mrf.mxu1 }
 0x21c   : > { %v1464_v11 = vadd.f32 %v1463_v10, %v1374_v56 }
 0x21d   : > { %1915 = vst [vmem:[%s3259_s10 + $0xc8] sm:$0xff] %v1851_v31  ;;  %v1639_v13 = vadd.f32 %v1638_v9, %v1550_v12  ;;  %1413 = vmatmul.bf16.gmra.mxu0 %v3477_v61 }
 0x21e   : > { %1502 = vmatmul.bf16.gmra.mxu1 %v3479_v63 }
 0x21f   : > { %v1719_v36 = vmul.f32 %v3585_v40, %v1639_v13  ;;  %1591 = vmatmul.bf16.gmra.mxu2 %v3481_v60 }
 0x220   : > { %1680 = vmatmul.bf16.gmra.mxu3 %v3483_v18 }
 0x221   : > { %v1789_v14 = vadd.f32 %v3591_v57, %v1719_v36 }
 0x222   : > { %v1552_v16 = vpop.f32.mrf.mxu2  ;;  %v1376_v38 = vpop.f32.mrf.mxu0 }
 0x223   : > { %v1853_v46 = vmax.f32 %v1789_v14, 0.0  ;;  %v1553_v17 = vadd.f32 %v1552_v16, %v1464_v11  ;;  %v1641_v15 = vpop.f32.mrf.mxu3  ;;  %v1465_v49 = vpop.f32.mrf.mxu1 }
 0x224   : > { %v1466_v63 = vadd.f32 %v1465_v49, %v1376_v38 }
 0x225   : > { %1917 = vst [vmem:[%s3259_s10 + $0xd8] sm:$0xff] %v1853_v46  ;;  %v1642_v61 = vadd.f32 %v1641_v15, %v1553_v17 }
 0x227   : > { %v1721_v32 = vmul.f32 %v3585_v40, %v1642_v61 }
 0x229   : > { %v1791_v39 = vadd.f32 %v3591_v57, %v1721_v32 }
 0x22a   : > { %v1554_v51 = vpop.f32.mrf.mxu2  ;;  %v1379_v50 = vpop.f32.mrf.mxu0 }
 0x22b   : > { %v1855_v60 = vmax.f32 %v1791_v39, 0.0  ;;  %v1555_v18 = vadd.f32 %v1554_v51, %v1466_v63  ;;  %v1643_v33 = vpop.f32.mrf.mxu3  ;;  %v1468_v34 = vpop.f32.mrf.mxu1 }
 0x22c   : > { %v1469_v4 = vadd.f32 %v1468_v34, %v1379_v50 }
 0x22d   : > { %1919 = vst [vmem:[%s3259_s10 + $0xe8] sm:$0xff] %v1855_v60  ;;  %v1644_v19 = vadd.f32 %v1643_v33, %v1555_v18 }
 0x22f   : > { %v1723_v35 = vmul.f32 %v3585_v40, %v1644_v19 }
 0x231   : > { %v1793_v54 = vadd.f32 %v3591_v57, %v1723_v35 }
 0x232   : > { %v1557_v42 = vpop.f32.mrf.mxu2  ;;  %v1381_v5 = vpop.f32.mrf.mxu0 }
 0x233   : > { %v1857_v43 = vmax.f32 %v1793_v54, 0.0  ;;  %v1558_v6 = vadd.f32 %v1557_v42, %v1469_v4  ;;  %v1646_v52 = vpop.f32.mrf.mxu3  ;;  %v1470_v55 = vpop.f32.mrf.mxu1 }
 0x234   : > { %v1471_v62 = vadd.f32 %v1470_v55, %v1381_v5 }
 0x235   : > { %1921 = vst [vmem:[%s3259_s10 + $0xf8] sm:$0xff] %v1857_v43  ;;  %v1647_v20 = vadd.f32 %v1646_v52, %v1558_v6 }
 0x237   : > { %v1725_v53 = vmul.f32 %v3585_v40, %v1647_v20 }
 0x239   : > { %v1795_v58 = vadd.f32 %v3591_v57, %v1725_v53 }
 0x23a   : > { %v1559_v37 = vpop.f32.mrf.mxu2  ;;  %v1384_v29 = vpop.f32.mrf.mxu0 }
 0x23b   : > { %v1859_v30 = vmax.f32 %v1795_v58, 0.0  ;;  %v1560_v28 = vadd.f32 %v1559_v37, %v1471_v62  ;;  %v1648_v24 = vpop.f32.mrf.mxu3  ;;  %v1473_v44 = vpop.f32.mrf.mxu1 }
 0x23c   : > { %v1474_v45 = vadd.f32 %v1473_v44, %v1384_v29 }
 0x23d   : > { %1923 = vst [vmem:[%s3259_s10 + $0x108] sm:$0xff] %v1859_v30  ;;  %v1649_v41 = vadd.f32 %v1648_v24, %v1560_v28 }
 0x23f   : > { %v1727_v25 = vmul.f32 %v3585_v40, %v1649_v41 }
 0x241   : > { %v1797_v22 = vadd.f32 %v3591_v57, %v1727_v25 }
 0x242   : > { %v1562_v47 = vpop.f32.mrf.mxu2  ;;  %v1386_v59 = vpop.f32.mrf.mxu0 }
 0x243   : > { %v1861_v0 = vmax.f32 %v1797_v22, 0.0  ;;  %v1563_v48 = vadd.f32 %v1562_v47, %v1474_v45  ;;  %v1651_v26 = vpop.f32.mrf.mxu3  ;;  %v1475_v23 = vpop.f32.mrf.mxu1 }
 0x244   : > { %v1476_v2 = vadd.f32 %v1475_v23, %v1386_v59 }
 0x245   : > { %1925 = vst [vmem:[%s3259_s10 + $0x118] sm:$0xff] %v1861_v0  ;;  %v1652_v1 = vadd.f32 %v1651_v26, %v1563_v48 }
 0x247   : > { %v1729_v8 = vmul.f32 %v3585_v40, %v1652_v1 }
 0x249   : > { %v1799_v27 = vadd.f32 %v3591_v57, %v1729_v8 }
 0x24a   : > { %v1564_v7 = vpop.f32.mrf.mxu2  ;;  %v1389_v12 = vpop.f32.mrf.mxu0 }
 0x24b   : > { %v1863_v3 = vmax.f32 %v1799_v27, 0.0  ;;  %v1565_v21 = vadd.f32 %v1564_v7, %v1476_v2  ;;  %v1653_v31 = vpop.f32.mrf.mxu3  ;;  %v1478_v9 = vpop.f32.mrf.mxu1 }
 0x24c   : > { %v1479_v13 = vadd.f32 %v1478_v9, %v1389_v12 }
 0x24d   : > { %1927 = vst [vmem:[%s3259_s10 + $0x128] sm:$0xff] %v1863_v3  ;;  %v1654_v56 = vadd.f32 %v1653_v31, %v1565_v21 }
 0x24f   : > { %v1731_v10 = vmul.f32 %v3585_v40, %v1654_v56 }
 0x251   : > { %v1801_v36 = vadd.f32 %v3591_v57, %v1731_v10 }
 0x252   : > { %v1567_v11 = vpop.f32.mrf.mxu2  ;;  %v1391_v17 = vpop.f32.mrf.mxu0 }
 0x253   : > { %v1865_v14 = vmax.f32 %v1801_v36, 0.0  ;;  %v1568_v16 = vadd.f32 %v1567_v11, %v1479_v13  ;;  %v1656_v46 = vpop.f32.mrf.mxu3  ;;  %v1480_v15 = vpop.f32.mrf.mxu1 }
 0x254   : > { %v1481_v32 = vadd.f32 %v1480_v15, %v1391_v17 }
 0x255   : > { %1929 = vst [vmem:[%s3259_s10 + $0x138] sm:$0xff] %v1865_v14  ;;  %v1657_v38 = vadd.f32 %v1656_v46, %v1568_v16 }
 0x257   : > { %v1733_v49 = vmul.f32 %v3585_v40, %v1657_v38 }
 0x259   : > { %v1803_v61 = vadd.f32 %v3591_v57, %v1733_v49 }
 0x25a   : > { %v1569_v39 = vpop.f32.mrf.mxu2  ;;  %v1394_v18 = vpop.f32.mrf.mxu0 }
 0x25b   : > { %v1867_v63 = vmax.f32 %v1803_v61, 0.0  ;;  %v1570_v51 = vadd.f32 %v1569_v39, %v1481_v32  ;;  %v1658_v60 = vpop.f32.mrf.mxu3  ;;  %v1483_v33 = vpop.f32.mrf.mxu1 }
 0x25c   : > { %v1484_v19 = vadd.f32 %v1483_v33, %v1394_v18 }
 0x25d   : > { %1931 = vst [vmem:[%s3259_s10 + $0x148] sm:$0xff] %v1867_v63  ;;  %v1659_v50 = vadd.f32 %v1658_v60, %v1570_v51 }
 0x25f   : > { %v1735_v34 = vmul.f32 %v3585_v40, %v1659_v50 }
 0x261   : > { %v1805_v35 = vadd.f32 %v3591_v57, %v1735_v34 }
 0x262   : > { %v1572_v4 = vpop.f32.mrf.mxu2  ;;  %v1396_v6 = vpop.f32.mrf.mxu0 }
 0x263   : > { %v1869_v54 = vmax.f32 %v1805_v35, 0.0  ;;  %v1573_v42 = vadd.f32 %v1572_v4, %v1484_v19  ;;  %v1661_v43 = vpop.f32.mrf.mxu3  ;;  %v1485_v52 = vpop.f32.mrf.mxu1 }
 0x264   : > { %v1486_v53 = vadd.f32 %v1485_v52, %v1396_v6 }
 0x265   : > { %1933 = vst [vmem:[%s3259_s10 + $0x158] sm:$0xff] %v1869_v54  ;;  %v1662_v5 = vadd.f32 %v1661_v43, %v1573_v42 }
 0x267   : > { %v1737_v55 = vmul.f32 %v3585_v40, %v1662_v5 }
 0x269   : > { %v1807_v20 = vadd.f32 %v3591_v57, %v1737_v55 }
 0x26a   : > { %v1574_v58 = vpop.f32.mrf.mxu2  ;;  %v1399_v28 = vpop.f32.mrf.mxu0 }
 0x26b   : > { %v1871_v62 = vmax.f32 %v1807_v20, 0.0  ;;  %v1575_v37 = vadd.f32 %v1574_v58, %v1486_v53  ;;  %v1663_v30 = vpop.f32.mrf.mxu3  ;;  %v1488_v24 = vpop.f32.mrf.mxu1 }
 0x26c   : > { %v1489_v41 = vadd.f32 %v1488_v24, %v1399_v28 }
 0x26d   : > { %1935 = vst [vmem:[%s3259_s10 + $0x168] sm:$0xff] %v1871_v62  ;;  %v1664_v29 = vadd.f32 %v1663_v30, %v1575_v37 }
 0x26f   : > { %v1739_v44 = vmul.f32 %v3585_v40, %v1664_v29 }
 0x271   : > { %v1809_v25 = vadd.f32 %v3591_v57, %v1739_v44 }
 0x272   : > { %v1577_v45 = vpop.f32.mrf.mxu2  ;;  %v1401_v48 = vpop.f32.mrf.mxu0 }
 0x273   : > { %v1873_v22 = vmax.f32 %v1809_v25, 0.0  ;;  %v1578_v47 = vadd.f32 %v1577_v45, %v1489_v41  ;;  %v1666_v0 = vpop.f32.mrf.mxu3  ;;  %v1490_v26 = vpop.f32.mrf.mxu1 }
 0x274   : > { %v1491_v8 = vadd.f32 %v1490_v26, %v1401_v48 }
 0x275   : > { %1937 = vst [vmem:[%s3259_s10 + $0x178] sm:$0xff] %v1873_v22  ;;  %v1667_v59 = vadd.f32 %v1666_v0, %v1578_v47 }
 0x277   : > { %v1741_v23 = vmul.f32 %v3585_v40, %v1667_v59 }
 0x279   : > { %v1811_v1 = vadd.f32 %v3591_v57, %v1741_v23 }
 0x27a   : > { %v1579_v27 = vpop.f32.mrf.mxu2  ;;  %v1404_v21 = vpop.f32.mrf.mxu0 }
 0x27b   : > { %v1875_v2 = vmax.f32 %v1811_v1, 0.0  ;;  %v1580_v7 = vadd.f32 %v1579_v27, %v1491_v8  ;;  %v1668_v3 = vpop.f32.mrf.mxu3  ;;  %v1493_v31 = vpop.f32.mrf.mxu1 }
 0x27c   : > { %v1494_v56 = vadd.f32 %v1493_v31, %v1404_v21 }
 0x27d   : > { %1939 = vst [vmem:[%s3259_s10 + $0x188] sm:$0xff] %v1875_v2  ;;  %v1669_v12 = vadd.f32 %v1668_v3, %v1580_v7 }
 0x27f   : > { %v1743_v9 = vmul.f32 %v3585_v40, %v1669_v12 }
 0x281   : > { %v1813_v10 = vadd.f32 %v3591_v57, %v1743_v9 }
 0x282   : > { %v1582_v13 = vpop.f32.mrf.mxu2  ;;  %v1406_v16 = vpop.f32.mrf.mxu0 }
 0x283   : > { %v1877_v36 = vmax.f32 %v1813_v10, 0.0  ;;  %v1583_v11 = vadd.f32 %v1582_v13, %v1494_v56  ;;  %v1671_v14 = vpop.f32.mrf.mxu3  ;;  %v1495_v46 = vpop.f32.mrf.mxu1 }
 0x284   : > { %v1496_v49 = vadd.f32 %v1495_v46, %v1406_v16 }
 0x285   : > { %1941 = vst [vmem:[%s3259_s10 + $0x198] sm:$0xff] %v1877_v36  ;;  %v1672_v17 = vadd.f32 %v1671_v14, %v1583_v11 }
 0x287   : > { %v1745_v15 = vmul.f32 %v3585_v40, %v1672_v17 }
 0x289   : > { %v1815_v38 = vadd.f32 %v3591_v57, %v1745_v15 }
 0x28a   : > { %v1584_v61 = vpop.f32.mrf.mxu2  ;;  %v1409_v51 = vpop.f32.mrf.mxu0 }
 0x28b   : > { %v1879_v32 = vmax.f32 %v1815_v38, 0.0  ;;  %v1585_v39 = vadd.f32 %v1584_v61, %v1496_v49  ;;  %v1673_v63 = vpop.f32.mrf.mxu3  ;;  %v1498_v60 = vpop.f32.mrf.mxu1 }
 0x28c   : > { %v1499_v50 = vadd.f32 %v1498_v60, %v1409_v51 }
 0x28d   : > { %1943 = vst [vmem:[%s3259_s10 + $0x1a8] sm:$0xff] %v1879_v32  ;;  %v1674_v18 = vadd.f32 %v1673_v63, %v1585_v39 }
 0x28f   : > { %v1747_v33 = vmul.f32 %v3585_v40, %v1674_v18 }
 0x291   : > { %v1817_v34 = vadd.f32 %v3591_v57, %v1747_v33 }
 0x292   : > { %v1587_v19 = vpop.f32.mrf.mxu2  ;;  %v1411_v42 = vpop.f32.mrf.mxu0 }
 0x293   : > { %v1881_v35 = vmax.f32 %v1817_v34, 0.0  ;;  %v1588_v4 = vadd.f32 %v1587_v19, %v1499_v50  ;;  %v1676_v54 = vpop.f32.mrf.mxu3  ;;  %v1500_v43 = vpop.f32.mrf.mxu1 }
 0x294   : > { %v1501_v55 = vadd.f32 %v1500_v43, %v1411_v42 }
 0x295   : > { %1945 = vst [vmem:[%s3259_s10 + $0x1b8] sm:$0xff] %v1881_v35  ;;  %v1677_v6 = vadd.f32 %v1676_v54, %v1588_v4 }
 0x297   : > { %v1749_v52 = vmul.f32 %v3585_v40, %v1677_v6 }
 0x299   : > { %v1819_v5 = vadd.f32 %v3591_v57, %v1749_v52 }
 0x29a   : > { %v1589_v20 = vpop.f32.mrf.mxu2  ;;  %v1414_v37 = vpop.f32.mrf.mxu0 }
 0x29b   : > { %v1883_v53 = vmax.f32 %v1819_v5, 0.0  ;;  %v1590_v58 = vadd.f32 %v1589_v20, %v1501_v55  ;;  %v1678_v62 = vpop.f32.mrf.mxu3  ;;  %v1503_v30 = vpop.f32.mrf.mxu1 }
 0x29c   : > { %v1504_v29 = vadd.f32 %v1503_v30, %v1414_v37 }
 0x29d   : > { %1947 = vst [vmem:[%s3259_s10 + $0x1c8] sm:$0xff] %v1883_v53  ;;  %v1679_v28 = vadd.f32 %v1678_v62, %v1590_v58 }
 0x29f   : > { %v1751_v24 = vmul.f32 %v3585_v40, %v1679_v28 }
 0x2a1   : > { %v1821_v44 = vadd.f32 %v3591_v57, %v1751_v24 }
 0x2a2   : > { %v1592_v41 = vpop.f32.mrf.mxu2  ;;  %v1416_v0 = vpop.f32.mrf.mxu0 }
 0x2a3   : > { %v1885_v25 = vmax.f32 %v1821_v44, 0.0  ;;  %v1593_v45 = vadd.f32 %v1592_v41, %v1504_v29  ;;  %v1681_v22 = vpop.f32.mrf.mxu3  ;;  %v1505_v48 = vpop.f32.mrf.mxu1 }
 0x2a4   : > { %v1506_v23 = vadd.f32 %v1505_v48, %v1416_v0 }
 0x2a5   : > { %1949 = vst [vmem:[%s3259_s10 + $0x1d8] sm:$0xff] %v1885_v25  ;;  %v1682_v47 = vadd.f32 %v1681_v22, %v1593_v45 }
 0x2a7   : > { %v1753_v26 = vmul.f32 %v3585_v40, %v1682_v47 }
 0x2a9   : > { %v1823_v59 = vadd.f32 %v3591_v57, %v1753_v26 }
 0x2aa   : > { %v1594_v1 = vpop.f32.mrf.mxu2 }
 0x2ab   : > { %v1887_v8 = vmax.f32 %v1823_v59, 0.0  ;;  %v1595_v27 = vadd.f32 %v1594_v1, %v1506_v23  ;;  %v1683_v2 = vpop.f32.mrf.mxu3 }
 0x2ad   : > { %1951 = vst [vmem:[%s3259_s10 + $0x1e8] sm:$0xff] %v1887_v8  ;;  %v1684_v7 = vadd.f32 %v1683_v2, %v1595_v27 }
 0x2af   : > { %v1755_v3 = vmul.f32 %v3585_v40, %v1684_v7 }
 0x2b1   : > { %v1825_v21 = vadd.f32 %v3591_v57, %v1755_v3 }
 0x2b3   : > { %v1889_v31 = vmax.f32 %v1825_v21, 0.0 }
 0x2b5   : > { %1953 = vst [vmem:[%s3259_s10 + $0x1f8] sm:$0xff] %v1889_v31 }
 0x2b6 PF: > { %s14_s15 = sadd.s32 1, %s2683_s15  }
 0x2b7   : > { %p11_p4 = scmp.ge.s32.totalorder %s14_s15, 4  }
 0x2b9   :  { %13 = sbr.rel (!%p11_p4) target bundleno = 1 (0x1), region = 66 }

</bundles_post_ra>
